<compile_context>
chip_gen: v6e
topology: v6e:2x2x1
jax: 0.10.0
libtpu: 0.0.40
codegen_flags: <defaults>
</compile_context>

<pallas_src>
import functools

import jax
import jax.numpy as jnp
from jax.experimental import pallas as pl
from jax.experimental.pallas import tpu as pltpu


def _round_up(x, m):
    return (x + m - 1) // m * m


def ffnn_kernel(x_ref, w1_ref, b1_ref, w2_ref, b2_ref,
                w3_ref, b3_ref, w4_ref, b4_ref, o_ref):
    # fc1 + ReLU  (bf16 operands, f32 MXU accumulation)
    h = jnp.dot(x_ref[...], w1_ref[...], preferred_element_type=jnp.float32)
    h = jnp.maximum(h + b1_ref[...], 0.0).astype(jnp.bfloat16)
    # dropout(p=0.1) -> identity in eval mode
    # fc2 + ReLU
    h = jnp.dot(h, w2_ref[...], preferred_element_type=jnp.float32)
    h = jnp.maximum(h + b2_ref[...], 0.0).astype(jnp.bfloat16)
    # fc3 + ReLU
    h = jnp.dot(h, w3_ref[...], preferred_element_type=jnp.float32)
    h = jnp.maximum(h + b3_ref[...], 0.0).astype(jnp.bfloat16)
    # fc4 (no activation)
    h = jnp.dot(h, w4_ref[...], preferred_element_type=jnp.float32)
    o_ref[...] = h + b4_ref[...]


def init_ffnn_params(key, input_length):
    """Deterministic init matching nn.Linear's U(-1/sqrt(in), 1/sqrt(in))."""
    dims = [input_length, 1500, 600, 200, 1]
    params = []
    for i in range(4):
        key, kw, kb = jax.random.split(key, 3)
        fan_in, fan_out = dims[i], dims[i + 1]
        bound = 1.0 / (fan_in ** 0.5)
        # stored as [in, out] (transposed vs torch's [out, in])
        w = jax.random.uniform(kw, (fan_in, fan_out), jnp.float32, -bound, bound)
        b = jax.random.uniform(kb, (fan_out,), jnp.float32, -bound, bound)
        params.append((w, b))
    return params


def _pad2(a, rows, cols):
    return jnp.pad(a, ((0, rows - a.shape[0]), (0, cols - a.shape[1])))


@functools.lru_cache(maxsize=None)
def _batch_tile_cap():
    """Generation-aware cap on rows per grid step."""
    try:
        kind = jax.devices()[0].device_kind.lower()
    except Exception:  # pragma: no cover - defensive
        return 512
    # v5e and older: a 256-row step is ~3 us of MXU work at 197 TF/s, so the
    # ~0.35 us per-step overhead is already <10%; bigger tiles buy nothing.
    if any(g in kind for g in ("v2", "v3", "v4", "v5")):
        return 256
    # v6e / v7x: 512-row tiles halve the per-step overhead fraction.
    return 512


def _batch_tiling(B, cap):
    """Pick (tile_b, padded_B) for the batch axis."""
    if B < 128:
        # Single grid step; pad only to the bf16 sublane quantum.
        tb = _round_up(B, 16)
        return tb, tb
    Bp = _round_up(B, 128)
    # Largest 128-multiple tile <= cap that divides Bp exactly (no extra batch
    # padding); among those prefer an even step count so the "parallel" axis
    # splits evenly across both v7x TensorCores.
    divisors = [t for t in range(128, min(cap, Bp) + 1, 128) if Bp % t == 0]
    even = [t for t in divisors if (Bp // t) % 2 == 0]
    tile_b = max(even) if even else max(divisors)
    return tile_b, Bp


@jax.jit
def ffnn_forward(x, params):
    B, D = x.shape
    dims = [D, 1500, 600, 200, 1]
    # fc1 reduction dim padded only to bf16 sublane quantum (block == full dim
    # is legal); hidden/output dims padded to lane width (128), not 256.
    pdims = [_round_up(D, 16)] + [_round_up(d, 128) for d in dims[1:]]

    tile_b, Bp = _batch_tiling(B, _batch_tile_cap())

    # Zero-pad and cast to bf16 (weights, activations); biases stay f32.
    xp = _pad2(x, Bp, pdims[0]).astype(jnp.bfloat16)
    padded = []
    for i, (w, b) in enumerate(params):
        wp = _pad2(w, pdims[i], pdims[i + 1]).astype(jnp.bfloat16)
        bp = jnp.pad(b, (0, pdims[i + 1] - b.shape[0])).reshape(1, pdims[i + 1])
        padded.extend([wp, bp])

    grid = (Bp // tile_b,)

    in_specs = [pl.BlockSpec((tile_b, pdims[0]), lambda i: (i, 0))]
    for li in range(4):
        # Constant index_map -> weights/biases are grid-resident (DMA'd once).
        in_specs.append(pl.BlockSpec((pdims[li], pdims[li + 1]), lambda i: (0, 0)))
        in_specs.append(pl.BlockSpec((1, pdims[li + 1]), lambda i: (0, 0)))

    flops = 2 * Bp * sum(pdims[i] * pdims[i + 1] for i in range(4))
    bytes_accessed = (
        Bp * pdims[0] * 2                                        # x (bf16)
        + sum(pdims[i] * pdims[i + 1] * 2 for i in range(4))     # weights (bf16)
        + sum(pdims[i + 1] * 4 for i in range(4))                # biases (f32)
        + Bp * pdims[4] * 4                                      # out (f32)
    )

    out_padded = pl.pallas_call(
        ffnn_kernel,
        out_shape=jax.ShapeDtypeStruct((Bp, pdims[4]), jnp.float32),
        grid_spec=pltpu.PrefetchScalarGridSpec(
            num_scalar_prefetch=0,
            grid=grid,
            in_specs=in_specs,
            out_specs=pl.BlockSpec((tile_b, pdims[4]), lambda i: (i, 0)),
        ),
        compiler_params=pltpu.CompilerParams(
            dimension_semantics=("parallel",),
            vmem_limit_bytes=48 << 20,
        ),
        cost_estimate=pl.CostEstimate(
            flops=flops, transcendentals=0, bytes_accessed=bytes_accessed),
    )(xp, *padded)

    # Strip batch / feature padding: final layer has 1 real output column.
    return out_padded[:B, :1]


def ffnn_reference_bf16(x, params):
    """Reference with the same bf16-operand / f32-accumulation recipe."""
    h = x.astype(jnp.bfloat16)
    for i, (w, b) in enumerate(params):
        h = jnp.dot(h, w.astype(jnp.bfloat16),
                    preferred_element_type=jnp.float32) + b
        if i < 3:
            h = jnp.maximum(h, 0.0).astype(jnp.bfloat16)
    return h


if __name__ == "__main__":
    key = jax.random.PRNGKey(0)
    input_length = 32

    kparam, kx1, kx2 = jax.random.split(key, 3)
    params = init_ffnn_params(kparam, input_length)

    # Small-batch path (single 16-row grid step).
    x_small = jax.random.normal(kx1, (8, input_length), jnp.float32)
    out_small = jax.block_until_ready(ffnn_forward(x_small, params))
    ref_small = ffnn_reference_bf16(x_small, params)
    assert out_small.shape == (8, 1), out_small.shape
    assert jnp.allclose(out_small, ref_small, atol=1e-2, rtol=1e-2), \
        "small-batch mismatch vs reference"

    # Multi-step grid path (exercises the tiled / megacore-friendly branch).
    x_big = jax.random.normal(kx2, (256, input_length), jnp.float32)
    out_big = jax.block_until_ready(ffnn_forward(x_big, params))
    ref_big = ffnn_reference_bf16(x_big, params)
    assert out_big.shape == (256, 1), out_big.shape
    assert jnp.allclose(out_big, ref_big, atol=1e-2, rtol=1e-2), \
        "large-batch mismatch vs reference"

    print("KERNEL_OK")
</pallas_src>

<mosaic_0001>
module attributes {stable_mosaic.version = 11 : i64} {
  func.func @ffnn_kernel(%arg0: i32, %arg1: memref<16x32xbf16, #tpu.memory_space<vmem>>, %arg2: memref<32x1536xbf16, #tpu.memory_space<vmem>>, %arg3: memref<1x1536xf32, #tpu.memory_space<vmem>>, %arg4: memref<1536x640xbf16, #tpu.memory_space<vmem>>, %arg5: memref<1x640xf32, #tpu.memory_space<vmem>>, %arg6: memref<640x256xbf16, #tpu.memory_space<vmem>>, %arg7: memref<1x256xf32, #tpu.memory_space<vmem>>, %arg8: memref<256x128xbf16, #tpu.memory_space<vmem>>, %arg9: memref<1x128xf32, #tpu.memory_space<vmem>>, %arg10: memref<16x128xf32, #tpu.memory_space<vmem>>) attributes {dimension_semantics = [#tpu.dimension_semantics<parallel>], iteration_bounds = array<i64: 1>, scalar_prefetch = 0 : i64, scratch_operands = 0 : i64, tpu.core_type = #tpu.core_type<tc>, window_params = [{transform_indices = @transform_0, window_bounds = array<i64: 16, 32>}, {pipeline_mode = #tpu.pipeline_mode<synchronous>, transform_indices = @transform_1, window_bounds = array<i64: 32, 1536>}, {pipeline_mode = #tpu.pipeline_mode<synchronous>, transform_indices = @transform_2, window_bounds = array<i64: 1, 1536>}, {pipeline_mode = #tpu.pipeline_mode<synchronous>, transform_indices = @transform_3, window_bounds = array<i64: 1536, 640>}, {pipeline_mode = #tpu.pipeline_mode<synchronous>, transform_indices = @transform_4, window_bounds = array<i64: 1, 640>}, {pipeline_mode = #tpu.pipeline_mode<synchronous>, transform_indices = @transform_5, window_bounds = array<i64: 640, 256>}, {pipeline_mode = #tpu.pipeline_mode<synchronous>, transform_indices = @transform_6, window_bounds = array<i64: 1, 256>}, {pipeline_mode = #tpu.pipeline_mode<synchronous>, transform_indices = @transform_7, window_bounds = array<i64: 256, 128>}, {pipeline_mode = #tpu.pipeline_mode<synchronous>, transform_indices = @transform_8, window_bounds = array<i64: 1, 128>}, {transform_indices = @transform_9, window_bounds = array<i64: 16, 128>}]} {
    %c0 = arith.constant 0 : index
    %c0_0 = arith.constant 0 : index
    %0 = vector.load %arg1[%c0, %c0_0] : memref<16x32xbf16, #tpu.memory_space<vmem>>, vector<16x32xbf16>
    %c0_1 = arith.constant 0 : index
    %c0_2 = arith.constant 0 : index
    %1 = vector.load %arg2[%c0_1, %c0_2] : memref<32x1536xbf16, #tpu.memory_space<vmem>>, vector<32x1536xbf16>
    %cst = arith.constant dense<0.000000e+00> : vector<16x1536xf32>
    %2 = tpu.matmul %0, %1, %cst {dimension_numbers = #tpu.dot_dimension_numbers<[1], [0], [0], [1], [0, 0, 1, 1], [], []>} : vector<16x32xbf16>, vector<32x1536xbf16>, vector<16x1536xf32> -> vector<16x1536xf32>
    %c0_3 = arith.constant 0 : index
    %c0_4 = arith.constant 0 : index
    %3 = vector.load %arg3[%c0_3, %c0_4] : memref<1x1536xf32, #tpu.memory_space<vmem>>, vector<1x1536xf32>
    %4 = vector.broadcast %3 : vector<1x1536xf32> to vector<16x1536xf32>
    %5 = arith.addf %2, %4 : vector<16x1536xf32>
    %cst_5 = arith.constant 0.000000e+00 : f32
    %6 = vector.broadcast %cst_5 : f32 to vector<16x1536xf32>
    %7 = arith.maximumf %5, %6 : vector<16x1536xf32>
    %8 = arith.truncf %7 : vector<16x1536xf32> to vector<16x1536xbf16>
    %c0_6 = arith.constant 0 : index
    %c0_7 = arith.constant 0 : index
    %9 = vector.load %arg4[%c0_6, %c0_7] : memref<1536x640xbf16, #tpu.memory_space<vmem>>, vector<1536x640xbf16>
    %cst_8 = arith.constant dense<0.000000e+00> : vector<16x640xf32>
    %10 = tpu.matmul %8, %9, %cst_8 {dimension_numbers = #tpu.dot_dimension_numbers<[1], [0], [0], [1], [0, 0, 1, 1], [], []>} : vector<16x1536xbf16>, vector<1536x640xbf16>, vector<16x640xf32> -> vector<16x640xf32>
    %c0_9 = arith.constant 0 : index
    %c0_10 = arith.constant 0 : index
    %11 = vector.load %arg5[%c0_9, %c0_10] : memref<1x640xf32, #tpu.memory_space<vmem>>, vector<1x640xf32>
    %12 = vector.broadcast %11 : vector<1x640xf32> to vector<16x640xf32>
    %13 = arith.addf %10, %12 : vector<16x640xf32>
    %cst_11 = arith.constant 0.000000e+00 : f32
    %14 = vector.broadcast %cst_11 : f32 to vector<16x640xf32>
    %15 = arith.maximumf %13, %14 : vector<16x640xf32>
    %16 = arith.truncf %15 : vector<16x640xf32> to vector<16x640xbf16>
    %c0_12 = arith.constant 0 : index
    %c0_13 = arith.constant 0 : index
    %17 = vector.load %arg6[%c0_12, %c0_13] : memref<640x256xbf16, #tpu.memory_space<vmem>>, vector<640x256xbf16>
    %cst_14 = arith.constant dense<0.000000e+00> : vector<16x256xf32>
    %18 = tpu.matmul %16, %17, %cst_14 {dimension_numbers = #tpu.dot_dimension_numbers<[1], [0], [0], [1], [0, 0, 1, 1], [], []>} : vector<16x640xbf16>, vector<640x256xbf16>, vector<16x256xf32> -> vector<16x256xf32>
    %c0_15 = arith.constant 0 : index
    %c0_16 = arith.constant 0 : index
    %19 = vector.load %arg7[%c0_15, %c0_16] : memref<1x256xf32, #tpu.memory_space<vmem>>, vector<1x256xf32>
    %20 = vector.broadcast %19 : vector<1x256xf32> to vector<16x256xf32>
    %21 = arith.addf %18, %20 : vector<16x256xf32>
    %cst_17 = arith.constant 0.000000e+00 : f32
    %22 = vector.broadcast %cst_17 : f32 to vector<16x256xf32>
    %23 = arith.maximumf %21, %22 : vector<16x256xf32>
    %24 = arith.truncf %23 : vector<16x256xf32> to vector<16x256xbf16>
    %c0_18 = arith.constant 0 : index
    %c0_19 = arith.constant 0 : index
    %25 = vector.load %arg8[%c0_18, %c0_19] : memref<256x128xbf16, #tpu.memory_space<vmem>>, vector<256x128xbf16>
    %cst_20 = arith.constant dense<0.000000e+00> : vector<16x128xf32>
    %26 = tpu.matmul %24, %25, %cst_20 {dimension_numbers = #tpu.dot_dimension_numbers<[1], [0], [0], [1], [0, 0, 1, 1], [], []>} : vector<16x256xbf16>, vector<256x128xbf16>, vector<16x128xf32> -> vector<16x128xf32>
    %c0_21 = arith.constant 0 : index
    %c0_22 = arith.constant 0 : index
    %27 = vector.load %arg9[%c0_21, %c0_22] : memref<1x128xf32, #tpu.memory_space<vmem>>, vector<1x128xf32>
    %28 = vector.broadcast %27 : vector<1x128xf32> to vector<16x128xf32>
    %29 = arith.addf %26, %28 : vector<16x128xf32>
    %c0_23 = arith.constant 0 : index
    %c0_24 = arith.constant 0 : index
    %30 = vector.load %arg10[%c0_23, %c0_24] : memref<16x128xf32, #tpu.memory_space<vmem>>, vector<16x128xf32>
    tpu.vector_store %arg10[%c0_23, %c0_24], %29 {strides = array<i32>} : memref<16x128xf32, #tpu.memory_space<vmem>>, vector<16x128xf32>,
    return
  }
  func.func @transform_0(%arg0: i32) -> (i32, i32) {
    %c0_i32 = arith.constant 0 : i32
    %c0_i32_0 = arith.constant 0 : i32
    return %arg0, %c0_i32 : i32, i32
  }
  func.func @transform_1(%arg0: i32) -> (i32, i32) {
    %c0_i32 = arith.constant 0 : i32
    %c0_i32_0 = arith.constant 0 : i32
    %c0_i32_1 = arith.constant 0 : i32
    return %c0_i32, %c0_i32_0 : i32, i32
  }
  func.func @transform_2(%arg0: i32) -> (i32, i32) {
    %c0_i32 = arith.constant 0 : i32
    %c0_i32_0 = arith.constant 0 : i32
    %c0_i32_1 = arith.constant 0 : i32
    return %c0_i32, %c0_i32_0 : i32, i32
  }
  func.func @transform_3(%arg0: i32) -> (i32, i32) {
    %c0_i32 = arith.constant 0 : i32
    %c0_i32_0 = arith.constant 0 : i32
    %c0_i32_1 = arith.constant 0 : i32
    return %c0_i32, %c0_i32_0 : i32, i32
  }
  func.func @transform_4(%arg0: i32) -> (i32, i32) {
    %c0_i32 = arith.constant 0 : i32
    %c0_i32_0 = arith.constant 0 : i32
    %c0_i32_1 = arith.constant 0 : i32
    return %c0_i32, %c0_i32_0 : i32, i32
  }
  func.func @transform_5(%arg0: i32) -> (i32, i32) {
    %c0_i32 = arith.constant 0 : i32
    %c0_i32_0 = arith.constant 0 : i32
    %c0_i32_1 = arith.constant 0 : i32
    return %c0_i32, %c0_i32_0 : i32, i32
  }
  func.func @transform_6(%arg0: i32) -> (i32, i32) {
    %c0_i32 = arith.constant 0 : i32
    %c0_i32_0 = arith.constant 0 : i32
    %c0_i32_1 = arith.constant 0 : i32
    return %c0_i32, %c0_i32_0 : i32, i32
  }
  func.func @transform_7(%arg0: i32) -> (i32, i32) {
    %c0_i32 = arith.constant 0 : i32
    %c0_i32_0 = arith.constant 0 : i32
    %c0_i32_1 = arith.constant 0 : i32
    return %c0_i32, %c0_i32_0 : i32, i32
  }
  func.func @transform_8(%arg0: i32) -> (i32, i32) {
    %c0_i32 = arith.constant 0 : i32
    %c0_i32_0 = arith.constant 0 : i32
    %c0_i32_1 = arith.constant 0 : i32
    return %c0_i32, %c0_i32_0 : i32, i32
  }
  func.func @transform_9(%arg0: i32) -> (i32, i32) {
    %c0_i32 = arith.constant 0 : i32
    %c0_i32_0 = arith.constant 0 : i32
    return %arg0, %c0_i32 : i32, i32
  }
}

</mosaic_0001>

<bundles_post_ra>
// kernel: ffnn_forward.1
= control target key start
LH: loop header
LB: loop body
LE: loop exit
PB: predicated region body
PF: predicated region fallthrough
CT: control target
= control target key end

     0   :  { %v6840_v1 = vmov 0   ;;  %vm248_vm0 = vcmask 261120   ;;  %s8918_s1 = inlined_call_operand.vmem [shape: bf16[32,1536], index: 1, kind: input, shape index: {}]   ;;  %s8919_s0 = inlined_call_operand.vmem [shape: bf16[16,32], index: 0, kind: input, shape index: {}]   ;;  %s8920_s3 = inlined_call_operand.vmem [shape: bf16[1536,640], index: 3, kind: input, shape index: {}]   ;;  %s8921_s2 = inlined_call_operand.vmem [shape: f32[1,1536], index: 2, kind: input, shape index: {}]   ;;  %s8922_s4 = inlined_call_operand.vmem [shape: f32[1,640], index: 4, kind: input, shape index: {}]   ;;  %s8923_s5 = inlined_call_operand.vmem [shape: bf16[640,256], index: 5, kind: input, shape index: {}]   ;;  %s8924_s7 = inlined_call_operand.vmem [shape: bf16[256,128], index: 7, kind: input, shape index: {}]   ;;  %s8925_s6 = inlined_call_operand.vmem [shape: f32[1,256], index: 6, kind: input, shape index: {}]   ;;  %s8926_s8 = inlined_call_operand.vmem [shape: f32[1,128], index: 8, kind: input, shape index: {}]   ;;  %s8927_s9 = inlined_call_operand.vmem [shape: f32[16,128], index: 9, kind: output, shape index: {}]  }
   0x1   :  { %v5994_v0 = vld [vmem:[%s8918_s1 + $0x64] ss:$48 sps:$4 sm:$0xff]   ;;  %284 = vmatprep.mubr.bf16.mxu0 %v6840_v1  ;;  %327 = vmatprep.mubr.bf16.mxu1 %v6840_v1  ;;  %v5996_v2 = vld [vmem:[%s8918_s1 + $0x6c] ss:$48 sps:$4 sm:$0xff]   ;;  %v5998_v3 = vld [vmem:[%s8918_s1 + $0x60] ss:$48 sps:$4 sm:$0xff]  }
   0x2   :  { %264 = vmatprep.subr.bf16.mxu0 %v5994_v0  ;;  %v5999_v4 = vld [vmem:[%s8918_s1 + $0x68] ss:$48 sps:$4 sm:$0xff]   ;;  %307 = vmatprep.subr.bf16.mxu1 %v5996_v2  ;;  %v6000_v5 = vld [vmem:[%s8918_s1 + $0x4] ss:$48 sps:$4 sm:$0xff]   ;;  %v6002_v6 = vld [vmem:[%s8918_s1 + $0xc] ss:$48 sps:$4 sm:$0xff]  }
   0x3   :  { %265 = vmatpush1.bf16.msra.mxu0 %v5998_v3  ;;  %308 = vmatpush1.bf16.msra.mxu1 %v5999_v4  ;;  %v6004_v7 = vld [vmem:[%s8918_s1] ss:$48 sps:$4 sm:$0xff]   ;;  %v6005_v8 = vld [vmem:[%s8918_s1 + $0x8] ss:$48 sps:$4 sm:$0xff]   ;;  %v6009_v11 = vld [vmem:[%s8918_s1 + $0x74] ss:$48 sps:$4 sm:$0xff]  }
   0x4   :  { %266 = vmatprep.subr.bf16.mxu0 %v6000_v5  ;;  %309 = vmatprep.subr.bf16.mxu1 %v6002_v6  ;;  %v6006_v9 = vld [vmem:[%s8919_s0] sm:$0xff]   ;;  %v6010_v12 = vld [vmem:[%s8918_s1 + $0x78] ss:$48 sps:$4 sm:$0xff]   ;;  %v6012_v13 = vld [vmem:[%s8918_s1 + $0x7c] ss:$48 sps:$4 sm:$0xff]  }
   0x5   :  { %v6007_v10 = vld [vmem:[%s8918_s1 + $0x70] ss:$48 sps:$4 sm:$0xff]   ;;  %v6015_v14 = vld [vmem:[%s8918_s1 + $0x14] ss:$48 sps:$4 sm:$0xff]   ;;  %v6018_v15 = vld [vmem:[%s8918_s1 + $0x1c] ss:$48 sps:$4 sm:$0xff]  }
   0x6   :  { %v6013_v16 = vld [vmem:[%s8918_s1 + $0x10] ss:$48 sps:$4 sm:$0xff]   ;;  %v6016_v17 = vld [vmem:[%s8918_s1 + $0x18] ss:$48 sps:$4 sm:$0xff]   ;;  %v6021_v18 = vld [vmem:[%s8918_s1 + $0x84] ss:$48 sps:$4 sm:$0xff]  }
   0x7   :  { %267 = vmatpush1.bf16.msra.mxu0 %v6004_v7  ;;  %310 = vmatpush1.bf16.msra.mxu1 %v6005_v8  ;;  %v6024_v19 = vld [vmem:[%s8918_s1 + $0x8c] ss:$48 sps:$4 sm:$0xff]   ;;  %v6019_v20 = vld [vmem:[%s8918_s1 + $0x80] ss:$48 sps:$4 sm:$0xff]   ;;  %v6022_v21 = vld [vmem:[%s8918_s1 + $0x88] ss:$48 sps:$4 sm:$0xff]  }
   0x8   :  { %350 = vmatprep.subr.bf16.mxu0 %v6009_v11  ;;  %393 = vmatprep.subr.bf16.mxu1 %v6012_v13  ;;  %v6027_v22 = vld [vmem:[%s8918_s1 + $0x24] ss:$48 sps:$4 sm:$0xff]   ;;  %v6030_v23 = vld [vmem:[%s8918_s1 + $0x2c] ss:$48 sps:$4 sm:$0xff]   ;;  %v6025_v24 = vld [vmem:[%s8918_s1 + $0x20] ss:$48 sps:$4 sm:$0xff]  }
   0x9   :  { %v6028_v25 = vld [vmem:[%s8918_s1 + $0x28] ss:$48 sps:$4 sm:$0xff]   ;;  %v6033_v26 = vld [vmem:[%s8920_s3 + $0x11c] ss:$20 sps:$4 sm:$0xff]   ;;  %v6045_v34 = vld [vmem:[%s8920_s3 + $0xcc] ss:$20 sps:$4 sm:$0xff]  }
   0xa   :  { %5256 = vmatmul.mubr.msk.bf16.vlgmr.msra.gmra.mxu0 %vm248_vm0, %v6006_v9  ;;  %5257 = vmatmul.mubr.msk.bf16.vlgmr.msra.gmra.mxu1 %vm248_vm0, %v6006_v9  ;;  %v6036_v27 = vld [vmem:[%s8920_s3 + $0x39c] ss:$20 sps:$4 sm:$0xff]   ;;  %v6031_v28 = vld [vmem:[%s8920_s3 + $0x118] ss:$20 sps:$4 sm:$0xff]   ;;  %v6039_v30 = vld [vmem:[%s8920_s3 + $0xf4] ss:$20 sps:$4 sm:$0xff]  }
   0xb   :  { %351 = vmatpush1.bf16.msra.mxu0 %v6007_v10  ;;  %394 = vmatpush1.bf16.msra.mxu1 %v6010_v12  ;;  %v6034_v29 = vld [vmem:[%s8920_s3 + $0x398] ss:$20 sps:$4 sm:$0xff]   ;;  %v6042_v31 = vld [vmem:[%s8920_s3 + $0x374] ss:$20 sps:$4 sm:$0xff]   ;;  %v6037_v32 = vld [vmem:[%s8920_s3 + $0xf0] ss:$20 sps:$4 sm:$0xff]  }
   0xc   :  { %352 = vmatprep.subr.bf16.mxu0 %v6015_v14  ;;  %395 = vmatprep.subr.bf16.mxu1 %v6018_v15  ;;  %v6040_v33 = vld [vmem:[%s8920_s3 + $0x370] ss:$20 sps:$4 sm:$0xff]   ;;  %v6048_v35 = vld [vmem:[%s8920_s3 + $0x34c] ss:$20 sps:$4 sm:$0xff]   ;;  %v6043_v36 = vld [vmem:[%s8920_s3 + $0xc8] ss:$20 sps:$4 sm:$0xff]  }
   0xd   :  { %370 = vmatprep.mubr.bf16.mxu0 %v6840_v1  ;;  %413 = vmatprep.mubr.bf16.mxu1 %v6840_v1  ;;  %v6046_v37 = vld [vmem:[%s8920_s3 + $0x348] ss:$20 sps:$4 sm:$0xff]   ;;  %v6051_v38 = vld [vmem:[%s8920_s3 + $0xa4] ss:$20 sps:$4 sm:$0xff]   ;;  %v6049_v40 = vld [vmem:[%s8920_s3 + $0xa0] ss:$20 sps:$4 sm:$0xff]  }
   0xe   :  { %v6054_v39 = vld [vmem:[%s8920_s3 + $0x324] ss:$20 sps:$4 sm:$0xff]   ;;  %v6052_v41 = vld [vmem:[%s8920_s3 + $0x320] ss:$20 sps:$4 sm:$0xff]   ;;  %v6057_v42 = vld [vmem:[%s8920_s3 + $0x7c] ss:$20 sps:$4 sm:$0xff]  }
   0xf   :  { %353 = vmatpush1.bf16.msra.mxu0 %v6013_v16  ;;  %396 = vmatpush1.bf16.msra.mxu1 %v6016_v17  ;;  %v6060_v43 = vld [vmem:[%s8920_s3 + $0x2fc] ss:$20 sps:$4 sm:$0xff]   ;;  %v6055_v44 = vld [vmem:[%s8920_s3 + $0x78] ss:$20 sps:$4 sm:$0xff]   ;;  %v6063_v46 = vld [vmem:[%s8920_s3 + $0x54] ss:$20 sps:$4 sm:$0xff]  }
  0x10   :  { %436 = vmatprep.subr.bf16.mxu0 %v6021_v18  ;;  %479 = vmatprep.subr.bf16.mxu1 %v6024_v19  ;;  %v6058_v45 = vld [vmem:[%s8920_s3 + $0x2f8] ss:$20 sps:$4 sm:$0xff]   ;;  %v6066_v47 = vld [vmem:[%s8920_s3 + $0x2d4] ss:$20 sps:$4 sm:$0xff]   ;;  %v6061_v48 = vld [vmem:[%s8920_s3 + $0x50] ss:$20 sps:$4 sm:$0xff]  }
  0x11   :  { %v6064_v49 = vld [vmem:[%s8920_s3 + $0x2d0] ss:$20 sps:$4 sm:$0xff]   ;;  %v6069_v50 = vld [vmem:[%s8920_s3 + $0x2c] ss:$20 sps:$4 sm:$0xff]   ;;  %v6067_v52 = vld [vmem:[%s8920_s3 + $0x28] ss:$20 sps:$4 sm:$0xff]  }
  0x12   :  { %5258 = vmatmul.mubr.msk.bf16.vlgmr.msra.gmra.mxu0 %vm248_vm0, %v6006_v9  ;;  %5259 = vmatmul.mubr.msk.bf16.vlgmr.msra.gmra.mxu1 %vm248_vm0, %v6006_v9  ;;  %v6072_v51 = vld [vmem:[%s8920_s3 + $0x2ac] ss:$20 sps:$4 sm:$0xff]   ;;  %v6070_v53 = vld [vmem:[%s8920_s3 + $0x2a8] ss:$20 sps:$4 sm:$0xff]   ;;  %v6075_v54 = vld [vmem:[%s8920_s3 + $0x4] ss:$20 sps:$4 sm:$0xff]  }
  0x13   :  { %437 = vmatpush1.bf16.msra.mxu0 %v6019_v20  ;;  %480 = vmatpush1.bf16.msra.mxu1 %v6022_v21  ;;  %v6078_v55 = vld [vmem:[%s8920_s3 + $0x284] ss:$20 sps:$4 sm:$0xff]   ;;  %v6073_v56 = vld [vmem:[%s8920_s3] ss:$20 sps:$4 sm:$0xff]   ;;  %v6081_v58 = vld [vmem:[%s8920_s3 + $0x25c] ss:$20 sps:$4 sm:$0xff]  }
  0x14   :  { %438 = vmatprep.subr.bf16.mxu0 %v6027_v22  ;;  %481 = vmatprep.subr.bf16.mxu1 %v6030_v23  ;;  %v6076_v57 = vld [vmem:[%s8920_s3 + $0x280] ss:$20 sps:$4 sm:$0xff]   ;;  %v6084_v59 = vld [vmem:[%s8920_s3 + $0x4dc] ss:$20 sps:$4 sm:$0xff]   ;;  %v6079_v60 = vld [vmem:[%s8920_s3 + $0x258] ss:$20 sps:$4 sm:$0xff]  }
  0x15   :  { %456 = vmatprep.mubr.bf16.mxu0 %v6840_v1  ;;  %499 = vmatprep.mubr.bf16.mxu1 %v6840_v1  ;;  %v6082_v61 = vld [vmem:[%s8920_s3 + $0x4d8] ss:$20 sps:$4 sm:$0xff]   ;;  %v6087_v62 = vld [vmem:[%s8920_s3 + $0x234] ss:$20 sps:$4 sm:$0xff]   ;;  %v6085_v0 = vld [vmem:[%s8920_s3 + $0x230] ss:$20 sps:$4 sm:$0xff]  }
  0x16   :  { %v6090_v63 = vld [vmem:[%s8920_s3 + $0x4b4] ss:$20 sps:$4 sm:$0xff]   ;;  %v6088_v2 = vld [vmem:[%s8920_s3 + $0x4b0] ss:$20 sps:$4 sm:$0xff]   ;;  %v6093_v3 = vld [vmem:[%s8920_s3 + $0x20c] ss:$20 sps:$4 sm:$0xff]  }
  0x17   :  { %439 = vmatpush1.bf16.msra.mxu0 %v6025_v24  ;;  %482 = vmatpush1.bf16.msra.mxu1 %v6028_v25  ;;  %v6096_v4 = vld [vmem:[%s8920_s3 + $0x48c] ss:$20 sps:$4 sm:$0xff]   ;;  %v6091_v5 = vld [vmem:[%s8920_s3 + $0x208] ss:$20 sps:$4 sm:$0xff]   ;;  %v6099_v7 = vld [vmem:[%s8920_s3 + $0x1e4] ss:$20 sps:$4 sm:$0xff]  }
  0x18   :  { %3645 = vmatprep.subr.bf16.mxu0 %v6033_v26  ;;  %3688 = vmatprep.subr.bf16.mxu1 %v6036_v27  ;;  %v6094_v6 = vld [vmem:[%s8920_s3 + $0x488] ss:$20 sps:$4 sm:$0xff]   ;;  %v6102_v8 = vld [vmem:[%s8920_s3 + $0x464] ss:$20 sps:$4 sm:$0xff]   ;;  %v6100_v10 = vld [vmem:[%s8920_s3 + $0x460] ss:$20 sps:$4 sm:$0xff]  }
  0x19   :  { %v6105_v11 = vld [vmem:[%s8920_s3 + $0x1bc] ss:$20 sps:$4 sm:$0xff]   ;;  %v6103_v13 = vld [vmem:[%s8920_s3 + $0x1b8] ss:$20 sps:$4 sm:$0xff]   ;;  %v6111_v15 = vld [vmem:[%s8920_s3 + $0x194] ss:$20 sps:$4 sm:$0xff]  }
  0x1a   :  { %5260 = vmatmul.mubr.msk.bf16.vlgmr.msra.gmra.mxu0 %vm248_vm0, %v6006_v9  ;;  %5261 = vmatmul.mubr.msk.bf16.vlgmr.msra.gmra.mxu1 %vm248_vm0, %v6006_v9  ;;  %v6097_v9 = vld [vmem:[%s8920_s3 + $0x1e0] ss:$20 sps:$4 sm:$0xff]   ;;  %v6108_v12 = vld [vmem:[%s8920_s3 + $0x43c] ss:$20 sps:$4 sm:$0xff]   ;;  %v6106_v14 = vld [vmem:[%s8920_s3 + $0x438] ss:$20 sps:$4 sm:$0xff]  }
  0x1b   :  { %3646 = vmatpush1.bf16.msra.mxu0 %v6031_v28  ;;  %3689 = vmatpush1.bf16.msra.mxu1 %v6034_v29  ;;  %v6114_v16 = vld [vmem:[%s8920_s3 + $0x414] ss:$20 sps:$4 sm:$0xff]   ;;  %v6109_v17 = vld [vmem:[%s8920_s3 + $0x190] ss:$20 sps:$4 sm:$0xff]   ;;  %v6117_v19 = vld [vmem:[%s8920_s3 + $0x16c] ss:$20 sps:$4 sm:$0xff]   ;;  %v63_v29 = vlaneseq }
  0x1c   :  { %3647 = vmatprep.subr.bf16.mxu0 %v6039_v30  ;;  %3690 = vmatprep.subr.bf16.mxu1 %v6042_v31  ;;  %v6112_v18 = vld [vmem:[%s8920_s3 + $0x410] ss:$20 sps:$4 sm:$0xff]   ;;  %v6120_v20 = vld [vmem:[%s8920_s3 + $0x3ec] ss:$20 sps:$4 sm:$0xff]   ;;  %v6115_v21 = vld [vmem:[%s8920_s3 + $0x168] ss:$20 sps:$4 sm:$0xff]  }
  0x1d   :  { %v6118_v22 = vld [vmem:[%s8920_s3 + $0x3e8] ss:$20 sps:$4 sm:$0xff]   ;;  %v6123_v23 = vld [vmem:[%s8920_s3 + $0x144] ss:$20 sps:$4 sm:$0xff]   ;;  %v6121_v25 = vld [vmem:[%s8920_s3 + $0x140] ss:$20 sps:$4 sm:$0xff]  }
  0x1e   :  { %v6126_v24 = vld [vmem:[%s8920_s3 + $0x3c4] ss:$20 sps:$4 sm:$0xff]   ;;  %v6124_v26 = vld [vmem:[%s8920_s3 + $0x3c0] ss:$20 sps:$4 sm:$0xff]   ;;  %v6129_v27 = vld [vmem:[%s8920_s3 + $0x61c] ss:$20 sps:$4 sm:$0xff]  }
  0x1f   :  { %3648 = vmatpush1.bf16.msra.mxu0 %v6037_v32  ;;  %3691 = vmatpush1.bf16.msra.mxu1 %v6040_v33  ;;  %v6132_v28 = vld [vmem:[%s8920_s3 + $0x89c] ss:$20 sps:$4 sm:$0xff]   ;;  %v7176_v30 = vshrl.u32 %v63_v29, 7  ;;  %v7187_v33 = vld [vmem:[%s8921_s2] sm:$0xff] }
  0x20   :  { %3649 = vmatprep.subr.bf16.mxu0 %v6045_v34  ;;  %3692 = vmatprep.subr.bf16.mxu1 %v6048_v35  ;;  %v6141_v29 = vld [vmem:[%s8920_s3 + $0x5cc] ss:$20 sps:$4 sm:$0xff]  }
  0x21   :  { %v7179_v31 = vsub.s32 0, %v7176_v30  ;;  %v7182_v32 = vsub.s32 2, %v7176_v30  ;;  %v7190_v34 = vsub.s32 1, %v7176_v30  ;;  %v7193_v35 = vsub.s32 3, %v7176_v30 }
  0x23   :  { %3650 = vmatpush1.bf16.msra.mxu0 %v6043_v36  ;;  %3693 = vmatpush1.bf16.msra.mxu1 %v6046_v37  ;;  %v66_v36 = vrot.slane %v7187_v33, %v7179_v31  ;;  %v74_v37 = vrot.slane %v7187_v33, %v7182_v32 }
  0x24   :  { %3651 = vmatprep.subr.bf16.mxu0 %v6051_v38  ;;  %3694 = vmatprep.subr.bf16.mxu1 %v6054_v39 }
  0x27   :  { %3652 = vmatpush1.bf16.msra.mxu0 %v6049_v40  ;;  %3695 = vmatpush1.bf16.msra.mxu1 %v6052_v41  ;;  %v70_v40 = vrot.slane %v7187_v33, %v7190_v34  ;;  %v78_v41 = vrot.slane %v7187_v33, %v7193_v35 }
  0x28   :  { %3653 = vmatprep.subr.bf16.mxu0 %v6057_v42  ;;  %3696 = vmatprep.subr.bf16.mxu1 %v6060_v43 }
  0x2b   :  { %3654 = vmatpush1.bf16.msra.mxu0 %v6055_v44  ;;  %3697 = vmatpush1.bf16.msra.mxu1 %v6058_v45  ;;  %v85_v44 = vsub.s32 5, %v7176_v30  ;;  %v93_v45 = vsub.s32 7, %v7176_v30 }
  0x2c   :  { %3655 = vmatprep.subr.bf16.mxu0 %v6063_v46  ;;  %3698 = vmatprep.subr.bf16.mxu1 %v6066_v47 }
  0x2f   :  { %3656 = vmatpush1.bf16.msra.mxu0 %v6061_v48  ;;  %3699 = vmatpush1.bf16.msra.mxu1 %v6064_v49 }
  0x30   :  { %3657 = vmatprep.subr.bf16.mxu0 %v6069_v50  ;;  %3700 = vmatprep.subr.bf16.mxu1 %v6072_v51 }
  0x33   :  { %3658 = vmatpush1.bf16.msra.mxu0 %v6067_v52  ;;  %3701 = vmatpush1.bf16.msra.mxu1 %v6070_v53 }
  0x34   :  { %3659 = vmatprep.subr.bf16.mxu0 %v6075_v54  ;;  %3702 = vmatprep.subr.bf16.mxu1 %v6078_v55 }
  0x37   :  { %3660 = vmatpush1.bf16.msra.mxu0 %v6073_v56  ;;  %3703 = vmatpush1.bf16.msra.mxu1 %v6076_v57  ;;  %v86_v56 = vrot.slane %v7187_v33, %v85_v44  ;;  %v94_v57 = vrot.slane %v7187_v33, %v93_v45  ;;  %v6150_v44 = vld [vmem:[%s8920_s3 + $0x824] ss:$20 sps:$4 sm:$0xff]   ;;  %v6145_v45 = vld [vmem:[%s8920_s3 + $0x5a0] ss:$20 sps:$4 sm:$0xff]  }
  0x38   :  { %3661 = vmatprep.subr.bf16.mxu0 %v6081_v58  ;;  %3704 = vmatprep.subr.bf16.mxu1 %v6084_v59 }
  0x3b   :  { %3662 = vmatpush2.bf16.msra.mxu0 %v6079_v60  ;;  %3705 = vmatpush2.bf16.msra.mxu1 %v6082_v61 }
  0x3c   :  { %3663 = vmatprep.subr.bf16.mxu0 %v6087_v62  ;;  %3706 = vmatprep.subr.bf16.mxu1 %v6090_v63 }
  0x3f   :  { %3664 = vmatpush2.bf16.msra.mxu0 %v6085_v0  ;;  %3707 = vmatpush2.bf16.msra.mxu1 %v6088_v2 }
  0x40   :  { %3665 = vmatprep.subr.bf16.mxu0 %v6093_v3  ;;  %3708 = vmatprep.subr.bf16.mxu1 %v6096_v4 }
  0x43   :  { %3666 = vmatpush2.bf16.msra.mxu0 %v6091_v5  ;;  %3709 = vmatpush2.bf16.msra.mxu1 %v6094_v6 }
  0x44   :  { %3667 = vmatprep.subr.bf16.mxu0 %v6099_v7  ;;  %3710 = vmatprep.subr.bf16.mxu1 %v6102_v8  ;;  %v6127_v7 = vld [vmem:[%s8920_s3 + $0x618] ss:$20 sps:$4 sm:$0xff]  }
  0x45   :  { %v6130_v8 = vld [vmem:[%s8920_s3 + $0x898] ss:$20 sps:$4 sm:$0xff]  }
  0x47   :  { %3668 = vmatpush2.bf16.msra.mxu0 %v6097_v9  ;;  %3711 = vmatpush2.bf16.msra.mxu1 %v6100_v10 }
  0x48   :  { %3669 = vmatprep.subr.bf16.mxu0 %v6105_v11  ;;  %3712 = vmatprep.subr.bf16.mxu1 %v6108_v12 }
  0x4b   :  { %3670 = vmatpush2.bf16.msra.mxu0 %v6103_v13  ;;  %3713 = vmatpush2.bf16.msra.mxu1 %v6106_v14 }
  0x4c   :  { %3671 = vmatprep.subr.bf16.mxu0 %v6111_v15  ;;  %3714 = vmatprep.subr.bf16.mxu1 %v6114_v16 }
  0x4f   :  { %3672 = vmatpush2.bf16.msra.mxu0 %v6109_v17  ;;  %3715 = vmatpush2.bf16.msra.mxu1 %v6112_v18  ;;  %v6135_v17 = vld [vmem:[%s8920_s3 + $0x5f4] ss:$20 sps:$4 sm:$0xff]  }
  0x50   :  { %3673 = vmatprep.subr.bf16.mxu0 %v6117_v19  ;;  %3716 = vmatprep.subr.bf16.mxu1 %v6120_v20  ;;  %v6138_v18 = vld [vmem:[%s8920_s3 + $0x874] ss:$20 sps:$4 sm:$0xff]  }
  0x53   :  { %3674 = vmatpush2.bf16.msra.mxu0 %v6115_v21  ;;  %3717 = vmatpush2.bf16.msra.mxu1 %v6118_v22  ;;  %v6133_v21 = vld [vmem:[%s8920_s3 + $0x5f0] ss:$20 sps:$4 sm:$0xff]  }
  0x54   :  { %3675 = vmatprep.subr.bf16.mxu0 %v6123_v23  ;;  %3718 = vmatprep.subr.bf16.mxu1 %v6126_v24  ;;  %v6136_v22 = vld [vmem:[%s8920_s3 + $0x870] ss:$20 sps:$4 sm:$0xff]  }
  0x57   :  { %3676 = vmatpush2.bf16.msra.mxu0 %v6121_v25  ;;  %3719 = vmatpush2.bf16.msra.mxu1 %v6124_v26 }
  0x58   :  { %3731 = vmatprep.subr.bf16.mxu0 %v6129_v27  ;;  %3774 = vmatprep.subr.bf16.mxu1 %v6132_v28 }
  0xca   :  { %v286_v38 = vpop.f32.mrf.mxu0  ;;  %v329_v39 = vpop.f32.mrf.mxu1 }
  0xcb   :  { %v287_v46 = vadd.f32 %v286_v38, %v66_v36  ;;  %v330_v47 = vadd.f32 %v329_v39, %v74_v37  ;;  %v6142_v38 = vld [vmem:[%s8920_s3 + $0x848] ss:$20 sps:$4 sm:$0xff]  }
  0xcc   :  { %v288_v42 = vpop.f32.mrf.mxu0  ;;  %v331_v43 = vpop.f32.mrf.mxu1 }
  0xcd   :  { %v289_v48 = vadd.f32 %v288_v42, %v70_v40  ;;  %v332_v49 = vadd.f32 %v331_v43, %v78_v41  ;;  %v510_v58 = vmax.f32 %v287_v46, 0.0  ;;  %v512_v59 = vmax.f32 %v330_v47, 0.0  ;;  %v6147_v43 = vld [vmem:[%s8920_s3 + $0x5a4] ss:$20 sps:$4 sm:$0xff]   ;;  %v6148_v46 = vld [vmem:[%s8920_s3 + $0x820] ss:$20 sps:$4 sm:$0xff]  }
  0xce   :  { %v290_v50 = vpop.f32.mrf.mxu0  ;;  %v333_v51 = vpop.f32.mrf.mxu1  ;;  %v6153_v47 = vld [vmem:[%s8920_s3 + $0x57c] ss:$20 sps:$4 sm:$0xff]  }
  0xcf   :  { %v291_v52 = vadd.f32 %v290_v50, %v66_v36  ;;  %v334_v53 = vadd.f32 %v333_v51, %v74_v37  ;;  %v511_v62 = vmax.f32 %v289_v48, 0.0  ;;  %v513_v63 = vmax.f32 %v332_v49, 0.0  ;;  %v6144_v36 = vld [vmem:[%s8920_s3 + $0x84c] ss:$20 sps:$4 sm:$0xff]   ;;  %v6139_v37 = vld [vmem:[%s8920_s3 + $0x5c8] ss:$20 sps:$4 sm:$0xff]  }
  0xd0   :  { %v292_v54 = vpop.f32.mrf.mxu0  ;;  %v335_v55 = vpop.f32.mrf.mxu1  ;;  %v6156_v48 = vld [vmem:[%s8920_s3 + $0x7fc] ss:$20 sps:$4 sm:$0xff]   ;;  %v6151_v49 = vld [vmem:[%s8920_s3 + $0x578] ss:$20 sps:$4 sm:$0xff]   ;;  %v6159_v51 = vld [vmem:[%s8920_s3 + $0x554] ss:$20 sps:$4 sm:$0xff]  }
  0xd1   :  { %v293_v60 = vadd.f32 %v292_v54, %v70_v40  ;;  %v336_v61 = vadd.f32 %v335_v55, %v78_v41  ;;  %v522_v0 = vmax.f32 %v291_v52, 0.0  ;;  %v524_v2 = vmax.f32 %v334_v53, 0.0  ;;  %v6154_v50 = vld [vmem:[%s8920_s3 + $0x7f8] ss:$20 sps:$4 sm:$0xff]   ;;  %v6162_v52 = vld [vmem:[%s8920_s3 + $0x7d4] ss:$20 sps:$4 sm:$0xff]  }
  0xd2   :  { %v7207_v3 = vpop.f32.mrf.mxu0  ;;  %v7209_v4 = vpop.f32.mrf.mxu1  ;;  %v6157_v53 = vld [vmem:[%s8920_s3 + $0x550] ss:$20 sps:$4 sm:$0xff]   ;;  %v6165_v55 = vld [vmem:[%s8920_s3 + $0x52c] ss:$20 sps:$4 sm:$0xff]  }
  0xd3   :  { %v523_v5 = vmax.f32 %v293_v60, 0.0  ;;  %v525_v6 = vmax.f32 %v336_v61, 0.0  ;;  %v7221_v15 = vpack.c.bf16 %v522_v0, %v510_v58  ;;  %v7223_v16 = vpack.c.bf16 %v524_v2, %v512_v59  ;;  %v6160_v54 = vld [vmem:[%s8920_s3 + $0x7d0] ss:$20 sps:$4 sm:$0xff]   ;;  %v6166_v58 = vld [vmem:[%s8920_s3 + $0x7a8] ss:$20 sps:$4 sm:$0xff]  }
  0xd4   :  { %v374_v9 = vpop.f32.mrf.mxu0  ;;  %v417_v10 = vpop.f32.mrf.mxu1  ;;  %v6171_v59 = vld [vmem:[%s8920_s3 + $0x504] ss:$20 sps:$4 sm:$0xff]   ;;  %v6169_v61 = vld [vmem:[%s8920_s3 + $0x500] ss:$20 sps:$4 sm:$0xff]   ;;  %v6180_v0 = vld [vmem:[%s8920_s3 + $0x9dc] ss:$20 sps:$4 sm:$0xff]  }
  0xd5   :  { %v7217_v11 = vpack.c.bf16 %v523_v5, %v511_v62  ;;  %v7219_v12 = vpack.c.bf16 %v525_v6, %v513_v63  ;;  %v375_v13 = vadd.f32 %v374_v9, %v86_v56  ;;  %v418_v14 = vadd.f32 %v417_v10, %v94_v57  ;;  %v6174_v60 = vld [vmem:[%s8920_s3 + $0x784] ss:$20 sps:$4 sm:$0xff]   ;;  %v6172_v62 = vld [vmem:[%s8920_s3 + $0x780] ss:$20 sps:$4 sm:$0xff]   ;;  %v6177_v63 = vld [vmem:[%s8920_s3 + $0x75c] ss:$20 sps:$4 sm:$0xff]  }
  0xd6   :  { %v7231_v19 = vpop.f32.mrf.mxu0  ;;  %v7233_v20 = vpop.f32.mrf.mxu1  ;;  %v6175_v2 = vld [vmem:[%s8920_s3 + $0x758] ss:$20 sps:$4 sm:$0xff]   ;;  %v6183_v6 = vld [vmem:[%s8920_s3 + $0x734] ss:$20 sps:$4 sm:$0xff]   ;;  %v6184_v9 = vld [vmem:[%s8920_s3 + $0x9b0] ss:$20 sps:$4 sm:$0xff]  }
  0xd7   :  { %3677 = vmatprep.mubr.bf16.mxu0 %v7217_v11  ;;  %3720 = vmatprep.mubr.bf16.mxu1 %v7219_v12  ;;  %v515_v25 = vmax.f32 %v375_v13, 0.0  ;;  %v517_v26 = vmax.f32 %v418_v14, 0.0  ;;  %v6178_v5 = vld [vmem:[%s8920_s3 + $0x9d8] ss:$20 sps:$4 sm:$0xff]   ;;  %v6187_v14 = vld [vmem:[%s8920_s3 + $0x708] ss:$20 sps:$4 sm:$0xff]  }
  0xd8   :  { %3678 = vmatmul.mubr.bf16.vlgmr.msra.gmra.mxu0 %v7221_v15  ;;  %3721 = vmatmul.mubr.bf16.vlgmr.msra.gmra.mxu1 %v7223_v16  ;;  %v378_v23 = vpop.f32.mrf.mxu0  ;;  %v421_v24 = vpop.f32.mrf.mxu1  ;;  %v6189_v10 = vld [vmem:[%s8920_s3 + $0x70c] ss:$20 sps:$4 sm:$0xff]  }
  0xd9   :  { %3732 = vmatpush1.bf16.msra.mxu0 %v6127_v7  ;;  %3775 = vmatpush1.bf16.msra.mxu1 %v6130_v8  ;;  %v379_v27 = vadd.f32 %v378_v23, %v86_v56  ;;  %v422_v28 = vadd.f32 %v421_v24, %v94_v57  ;;  %v6168_v56 = vld [vmem:[%s8920_s3 + $0x7ac] ss:$20 sps:$4 sm:$0xff]   ;;  %v6163_v57 = vld [vmem:[%s8920_s3 + $0x528] ss:$20 sps:$4 sm:$0xff]   ;;  %v6181_v8 = vld [vmem:[%s8920_s3 + $0x730] ss:$20 sps:$4 sm:$0xff]  }
  0xda   :  { %3733 = vmatprep.subr.bf16.mxu0 %v6135_v17  ;;  %3776 = vmatprep.subr.bf16.mxu1 %v6138_v18  ;;  %v6186_v7 = vld [vmem:[%s8920_s3 + $0x9b4] ss:$20 sps:$4 sm:$0xff]   ;;  %v6192_v13 = vld [vmem:[%s8920_s3 + $0x98c] ss:$20 sps:$4 sm:$0xff]   ;;  %v6195_v18 = vld [vmem:[%s8920_s3 + $0x6e4] ss:$20 sps:$4 sm:$0xff]   ;;  %v7371_v24 = vpop.f32.mrf.mxu0 }
  0xdb   :  { %v527_v39 = vmax.f32 %v379_v27, 0.0  ;;  %v529_v40 = vmax.f32 %v422_v28, 0.0  ;;  %v6190_v17 = vld [vmem:[%s8920_s3 + $0x988] ss:$20 sps:$4 sm:$0xff]   ;;  %v6196_v23 = vld [vmem:[%s8920_s3 + $0x960] ss:$20 sps:$4 sm:$0xff]  }
  0xdc   :  { %v89_v27 = vsub.s32 6, %v7176_v30  ;;  %v6201_v28 = vld [vmem:[%s8920_s3 + $0x6bc] ss:$20 sps:$4 sm:$0xff]  }
  0xdd   :  { %3734 = vmatpush1.bf16.msra.mxu0 %v6133_v21  ;;  %3777 = vmatpush1.bf16.msra.mxu1 %v6136_v22  ;;  %v7257_v41 = vpack.c.bf16 %v527_v39, %v515_v25  ;;  %v7259_v42 = vpack.c.bf16 %v529_v40, %v517_v26  ;;  %v6198_v21 = vld [vmem:[%s8920_s3 + $0x964] ss:$20 sps:$4 sm:$0xff]   ;;  %v6193_v22 = vld [vmem:[%s8920_s3 + $0x6e0] ss:$20 sps:$4 sm:$0xff]   ;;  %v7373_v25 = vpop.f32.mrf.mxu1  ;;  %v81_v26 = vsub.s32 4, %v7176_v30 }
  0xde   :  { %3735 = vmatprep.subr.bf16.mxu0 %v6141_v29  ;;  %3778 = vmatprep.subr.bf16.mxu1 %v6144_v36  ;;  %v6204_v29 = vld [vmem:[%s8920_s3 + $0x93c] ss:$20 sps:$4 sm:$0xff]   ;;  %v6199_v36 = vld [vmem:[%s8920_s3 + $0x6b8] ss:$20 sps:$4 sm:$0xff]   ;;  %v6207_v40 = vld [vmem:[%s8920_s3 + $0x694] ss:$20 sps:$4 sm:$0xff]  }
  0xdf   :  { %3763 = vmatprep.mubr.bf16.mxu0 %v7257_v41  ;;  %3806 = vmatprep.mubr.bf16.mxu1 %v7259_v42  ;;  %v503_v39 = vpop.f32.mrf.mxu1  ;;  %v6825_v30 = vld [vmem:[%s8924_s7 + $0x70] sm:$0xff]  }
  0xe1   :  { %3736 = vmatpush1.bf16.msra.mxu0 %v6139_v37  ;;  %3779 = vmatpush1.bf16.msra.mxu1 %v6142_v38  ;;  %v6202_v37 = vld [vmem:[%s8920_s3 + $0x938] ss:$20 sps:$4 sm:$0xff]   ;;  %v460_v38 = vpop.f32.mrf.mxu0 }
  0xe2   :  { %3737 = vmatprep.subr.bf16.mxu0 %v6147_v43  ;;  %3780 = vmatprep.subr.bf16.mxu1 %v6150_v44  ;;  %v6210_v43 = vld [vmem:[%s8920_s3 + $0x914] ss:$20 sps:$4 sm:$0xff]   ;;  %v82_v44 = vrot.slane %v7187_v33, %v81_v26 }
  0xe5   :  { %3738 = vmatpush1.bf16.msra.mxu0 %v6145_v45  ;;  %3781 = vmatpush1.bf16.msra.mxu1 %v6148_v46  ;;  %v90_v45 = vrot.slane %v7187_v33, %v89_v27  ;;  %v6205_v46 = vld [vmem:[%s8920_s3 + $0x690] ss:$20 sps:$4 sm:$0xff]   ;;  %v6213_v33 = vld [vmem:[%s8920_s3 + $0x66c] ss:$20 sps:$4 sm:$0xff]   ;;  %v6234_v27 = vld [vmem:[%s8920_s3 + $0xd74] ss:$20 sps:$4 sm:$0xff]  }
  0xe6   :  { %3739 = vmatprep.subr.bf16.mxu0 %v6153_v47  ;;  %3782 = vmatprep.subr.bf16.mxu1 %v6156_v48  ;;  %v6208_v47 = vld [vmem:[%s8920_s3 + $0x910] ss:$20 sps:$4 sm:$0xff]   ;;  %v7408_v48 = vld [vmem:[%s8921_s2 + $0x8] sm:$0xf] }
  0xe9   :  { %3740 = vmatpush1.bf16.msra.mxu0 %v6151_v49  ;;  %3783 = vmatpush1.bf16.msra.mxu1 %v6154_v50  ;;  %v7410_v49 = vpop.f32.mrf.mxu0  ;;  %v7412_v50 = vpop.f32.mrf.mxu1 }
  0xea   :  { %3741 = vmatprep.subr.bf16.mxu0 %v6159_v51  ;;  %3784 = vmatprep.subr.bf16.mxu1 %v6162_v52  ;;  %v6216_v51 = vld [vmem:[%s8920_s3 + $0x8ec] ss:$20 sps:$4 sm:$0xff]   ;;  %v102_v52 = vrot.slane %v7408_v48, %v7190_v34 }
  0xed   :  { %3742 = vmatpush1.bf16.msra.mxu0 %v6157_v53  ;;  %3785 = vmatpush1.bf16.msra.mxu1 %v6160_v54  ;;  %v110_v53 = vrot.slane %v7408_v48, %v7193_v35  ;;  %v373_v54 = vadd.f32 %v7207_v3, %v82_v44  ;;  %v6219_v3 = vld [vmem:[%s8920_s3 + $0x644] ss:$20 sps:$4 sm:$0xff]  }
  0xee   :  { %3743 = vmatprep.subr.bf16.mxu0 %v6165_v55  ;;  %3786 = vmatprep.subr.bf16.mxu1 %v6168_v56  ;;  %v416_v55 = vadd.f32 %v7209_v4, %v90_v45  ;;  %v6211_v56 = vld [vmem:[%s8920_s3 + $0x668] ss:$20 sps:$4 sm:$0xff]   ;;  %v6222_v4 = vld [vmem:[%s8920_s3 + $0x8c4] ss:$20 sps:$4 sm:$0xff]  }
  0xf1   :  { %3744 = vmatpush1.bf16.msra.mxu0 %v6163_v57  ;;  %3787 = vmatpush1.bf16.msra.mxu1 %v6166_v58  ;;  %v6214_v57 = vld [vmem:[%s8920_s3 + $0x8e8] ss:$20 sps:$4 sm:$0xff]   ;;  %v464_v58 = vpop.f32.mrf.mxu0 }
  0xf2   :  { %3745 = vmatprep.subr.bf16.mxu0 %v6171_v59  ;;  %3788 = vmatprep.subr.bf16.mxu1 %v6174_v60  ;;  %v507_v59 = vpop.f32.mrf.mxu1  ;;  %v377_v60 = vadd.f32 %v7231_v19, %v82_v44  ;;  %v6217_v19 = vld [vmem:[%s8920_s3 + $0x640] ss:$20 sps:$4 sm:$0xff]   ;;  %v6235_v44 = vld [vmem:[%s8920_s3 + $0xac8] ss:$20 sps:$4 sm:$0xff]  }
  0xf5   :  { %3746 = vmatpush1.bf16.msra.mxu0 %v6169_v61  ;;  %3789 = vmatpush1.bf16.msra.mxu1 %v6172_v62  ;;  %v420_v61 = vadd.f32 %v7233_v20, %v90_v45  ;;  %v461_v62 = vadd.f32 %v460_v38, %v102_v52  ;;  %v6220_v20 = vld [vmem:[%s8920_s3 + $0x8c0] ss:$20 sps:$4 sm:$0xff]   ;;  %v6238_v45 = vld [vmem:[%s8920_s3 + $0xd48] ss:$20 sps:$4 sm:$0xff]  }
  0xf6   :  { %3747 = vmatprep.subr.bf16.mxu0 %v6177_v63  ;;  %3790 = vmatprep.subr.bf16.mxu1 %v6180_v0  ;;  %v504_v63 = vadd.f32 %v503_v39, %v110_v53  ;;  %v514_v0 = vmax.f32 %v373_v54, 0.0  ;;  %v6232_v39 = vld [vmem:[%s8920_s3 + $0xd70] ss:$20 sps:$4 sm:$0xff]   ;;  %v6247_v54 = vld [vmem:[%s8920_s3 + $0xa78] ss:$20 sps:$4 sm:$0xff]  }
  0xf9   :  { %3748 = vmatpush2.bf16.msra.mxu0 %v6175_v2  ;;  %3791 = vmatpush2.bf16.msra.mxu1 %v6178_v5  ;;  %v516_v2 = vmax.f32 %v416_v55, 0.0  ;;  %v465_v5 = vadd.f32 %v464_v58, %v102_v52  ;;  %v6249_v52 = vld [vmem:[%s8920_s3 + $0xa7c] ss:$20 sps:$4 sm:$0xff]   ;;  %v6250_v55 = vld [vmem:[%s8920_s3 + $0xcf8] ss:$20 sps:$4 sm:$0xff]  }
  0xfa   :  { %3749 = vmatprep.subr.bf16.mxu0 %v6183_v6  ;;  %3792 = vmatprep.subr.bf16.mxu1 %v6186_v7  ;;  %v508_v6 = vadd.f32 %v507_v59, %v110_v53  ;;  %v6225_v7 = vld [vmem:[%s8920_s3 + $0xb1c] ss:$20 sps:$4 sm:$0xff]  }
  0xfb   :  { %v6252_v53 = vld [vmem:[%s8920_s3 + $0xcfc] ss:$20 sps:$4 sm:$0xff]  }
  0xfc   :  { %v6253_v58 = vld [vmem:[%s8920_s3 + $0xa50] ss:$20 sps:$4 sm:$0xff]  }
  0xfd   :  { %3750 = vmatpush2.bf16.msra.mxu0 %v6181_v8  ;;  %3793 = vmatpush2.bf16.msra.mxu1 %v6184_v9  ;;  %v526_v8 = vmax.f32 %v377_v60, 0.0  ;;  %v528_v9 = vmax.f32 %v420_v61, 0.0  ;;  %v6256_v59 = vld [vmem:[%s8920_s3 + $0xcd0] ss:$20 sps:$4 sm:$0xff]   ;;  %v6261_v60 = vld [vmem:[%s8920_s3 + $0xa2c] ss:$20 sps:$4 sm:$0xff]  }
  0xfe   :  { %3751 = vmatprep.subr.bf16.mxu0 %v6189_v10  ;;  %3794 = vmatprep.subr.bf16.mxu1 %v6192_v13  ;;  %v6228_v10 = vld [vmem:[%s8920_s3 + $0xd9c] ss:$20 sps:$4 sm:$0xff]   ;;  %v519_v13 = vmax.f32 %v461_v62, 0.0  ;;  %v6264_v61 = vld [vmem:[%s8920_s3 + $0xcac] ss:$20 sps:$4 sm:$0xff]  }
  0xff   :  { %v6267_v62 = vld [vmem:[%s8920_s3 + $0xa04] ss:$20 sps:$4 sm:$0xff]  }
 0x101   :  { %3752 = vmatpush2.bf16.msra.mxu0 %v6187_v14  ;;  %3795 = vmatpush2.bf16.msra.mxu1 %v6190_v17  ;;  %v521_v14 = vmax.f32 %v504_v63, 0.0  ;;  %v6223_v17 = vld [vmem:[%s8920_s3 + $0xb18] ss:$20 sps:$4 sm:$0xff]  }
 0x102   :  { %3753 = vmatprep.subr.bf16.mxu0 %v6195_v18  ;;  %3796 = vmatprep.subr.bf16.mxu1 %v6198_v21  ;;  %v6226_v18 = vld [vmem:[%s8920_s3 + $0xd98] ss:$20 sps:$4 sm:$0xff]   ;;  %v531_v21 = vmax.f32 %v465_v5, 0.0 }
 0x103   :  { %v6270_v63 = vld [vmem:[%s8920_s3 + $0xc84] ss:$20 sps:$4 sm:$0xff]  }
 0x104   :  { %v6271_v5 = vld [vmem:[%s8920_s3 + $0xc58] ss:$20 sps:$4 sm:$0xff]  }
 0x105   :  { %3754 = vmatpush2.bf16.msra.mxu0 %v6193_v22  ;;  %3797 = vmatpush2.bf16.msra.mxu1 %v6196_v23  ;;  %v533_v22 = vmax.f32 %v508_v6, 0.0  ;;  %v6231_v23 = vld [vmem:[%s8920_s3 + $0xaf4] ss:$20 sps:$4 sm:$0xff]   ;;  %v6274_v6 = vld [vmem:[%s8920_s3 + $0xed8] ss:$20 sps:$4 sm:$0xff]  }
 0x106   :  { %3755 = vmatprep.subr.bf16.mxu0 %v6201_v28  ;;  %3798 = vmatprep.subr.bf16.mxu1 %v6204_v29  ;;  %v7464_v28 = vpack.c.bf16 %v526_v8, %v514_v0  ;;  %v7466_v29 = vpack.c.bf16 %v528_v9, %v516_v2  ;;  %v6265_v0 = vld [vmem:[%s8920_s3 + $0xa00] ss:$20 sps:$4 sm:$0xff]   ;;  %v6277_v9 = vld [vmem:[%s8920_s3 + $0xc30] ss:$20 sps:$4 sm:$0xff]  }
 0x107   :  { %v7473_v38 = vpack.c.bf16 %v533_v22, %v521_v14  ;;  %v6268_v2 = vld [vmem:[%s8920_s3 + $0xc80] ss:$20 sps:$4 sm:$0xff]   ;;  %v6294_v22 = vld [vmem:[%s8920_s3 + $0xe64] ss:$20 sps:$4 sm:$0xff]  }
 0x108   :  { %v6282_v8 = vld [vmem:[%s8920_s3 + $0xeb4] ss:$20 sps:$4 sm:$0xff]   ;;  %v6288_v14 = vld [vmem:[%s8920_s3 + $0xe8c] ss:$20 sps:$4 sm:$0xff]  }
 0x109   :  { %3756 = vmatpush2.bf16.msra.mxu0 %v6199_v36  ;;  %3799 = vmatpush2.bf16.msra.mxu1 %v6202_v37  ;;  %v6229_v36 = vld [vmem:[%s8920_s3 + $0xaf0] ss:$20 sps:$4 sm:$0xff]   ;;  %v7471_v37 = vpack.c.bf16 %v531_v21, %v519_v13  ;;  %v6285_v13 = vld [vmem:[%s8920_s3 + $0xc0c] ss:$20 sps:$4 sm:$0xff]  }
 0x10a   :  { %3757 = vmatprep.subr.bf16.mxu0 %v6207_v40  ;;  %3800 = vmatprep.subr.bf16.mxu1 %v6210_v43  ;;  %v6237_v40 = vld [vmem:[%s8920_s3 + $0xacc] ss:$20 sps:$4 sm:$0xff]   ;;  %v6291_v21 = vld [vmem:[%s8920_s3 + $0xbe4] ss:$20 sps:$4 sm:$0xff]  }
 0x10b   :  { %v6240_v43 = vld [vmem:[%s8920_s3 + $0xd4c] ss:$20 sps:$4 sm:$0xff]  }
 0x10d   :  { %3758 = vmatpush2.bf16.msra.mxu0 %v6205_v46  ;;  %3801 = vmatpush2.bf16.msra.mxu1 %v6208_v47  ;;  %v6243_v46 = vld [vmem:[%s8920_s3 + $0xaa4] ss:$20 sps:$4 sm:$0xff]  }
 0x10e   :  { %3759 = vmatprep.subr.bf16.mxu0 %v6213_v33  ;;  %3802 = vmatprep.subr.bf16.mxu1 %v6216_v51  ;;  %v6246_v47 = vld [vmem:[%s8920_s3 + $0xd24] ss:$20 sps:$4 sm:$0xff]   ;;  %v6241_v33 = vld [vmem:[%s8920_s3 + $0xaa0] ss:$20 sps:$4 sm:$0xff]  }
 0x10f   :  { %v6244_v51 = vld [vmem:[%s8920_s3 + $0xd20] ss:$20 sps:$4 sm:$0xff]  }
 0x111   :  { %3760 = vmatpush2.bf16.msra.mxu0 %v6211_v56  ;;  %3803 = vmatpush2.bf16.msra.mxu1 %v6214_v57  ;;  %v6255_v56 = vld [vmem:[%s8920_s3 + $0xa54] ss:$20 sps:$4 sm:$0xff]  }
 0x112   :  { %3761 = vmatprep.subr.bf16.mxu0 %v6219_v3  ;;  %3804 = vmatprep.subr.bf16.mxu1 %v6222_v4  ;;  %v6258_v57 = vld [vmem:[%s8920_s3 + $0xcd4] ss:$20 sps:$4 sm:$0xff]  }
 0x113   :  { %v6259_v3 = vld [vmem:[%s8920_s3 + $0xa28] ss:$20 sps:$4 sm:$0xff]  }
 0x114   :  { %v6262_v4 = vld [vmem:[%s8920_s3 + $0xca8] ss:$20 sps:$4 sm:$0xff]  }
 0x115   :  { %3762 = vmatpush2.bf16.msra.mxu0 %v6217_v19  ;;  %3805 = vmatpush2.bf16.msra.mxu1 %v6220_v20  ;;  %v6273_v19 = vld [vmem:[%s8920_s3 + $0xc5c] ss:$20 sps:$4 sm:$0xff]  }
 0x116   :  { %3817 = vmatprep.subr.bf16.mxu0 %v6225_v7  ;;  %3860 = vmatprep.subr.bf16.mxu1 %v6228_v10  ;;  %v6276_v20 = vld [vmem:[%s8920_s3 + $0xedc] ss:$20 sps:$4 sm:$0xff]   ;;  %v6279_v7 = vld [vmem:[%s8920_s3 + $0xc34] ss:$20 sps:$4 sm:$0xff]  }
 0x117   :  { %v6280_v10 = vld [vmem:[%s8920_s3 + $0xeb0] ss:$20 sps:$4 sm:$0xff]  }
 0x118   :  { %3764 = vmatmul.mubr.bf16.vlgmr.msra.gmra.mxu0 %v7464_v28  ;;  %3807 = vmatmul.mubr.bf16.vlgmr.msra.gmra.mxu1 %v7466_v29 }
 0x119   :  { %3818 = vmatpush1.bf16.msra.mxu0 %v6223_v17  ;;  %3861 = vmatpush1.bf16.msra.mxu1 %v6226_v18  ;;  %v6283_v17 = vld [vmem:[%s8920_s3 + $0xc08] ss:$20 sps:$4 sm:$0xff]  }
 0x11a   :  { %3819 = vmatprep.subr.bf16.mxu0 %v6231_v23  ;;  %3862 = vmatprep.subr.bf16.mxu1 %v6234_v27  ;;  %v6286_v18 = vld [vmem:[%s8920_s3 + $0xe88] ss:$20 sps:$4 sm:$0xff]   ;;  %v6289_v23 = vld [vmem:[%s8920_s3 + $0xbe0] ss:$20 sps:$4 sm:$0xff]  }
 0x11b   :  { %3849 = vmatprep.mubr.bf16.mxu0 %v7471_v37  ;;  %3892 = vmatprep.mubr.bf16.mxu1 %v7473_v38  ;;  %v6292_v27 = vld [vmem:[%s8920_s3 + $0xe60] ss:$20 sps:$4 sm:$0xff]  }
 0x11d   :  { %3820 = vmatpush1.bf16.msra.mxu0 %v6229_v36  ;;  %3863 = vmatpush1.bf16.msra.mxu1 %v6232_v39  ;;  %v6297_v36 = vld [vmem:[%s8920_s3 + $0xbbc] ss:$20 sps:$4 sm:$0xff]  }
 0x11e   :  { %3821 = vmatprep.subr.bf16.mxu0 %v6237_v40  ;;  %3864 = vmatprep.subr.bf16.mxu1 %v6240_v43  ;;  %v6300_v39 = vld [vmem:[%s8920_s3 + $0xe3c] ss:$20 sps:$4 sm:$0xff]   ;;  %v6295_v40 = vld [vmem:[%s8920_s3 + $0xbb8] ss:$20 sps:$4 sm:$0xff]  }
 0x11f   :  { %v6298_v43 = vld [vmem:[%s8920_s3 + $0xe38] ss:$20 sps:$4 sm:$0xff]  }
 0x121   :  { %3822 = vmatpush1.bf16.msra.mxu0 %v6235_v44  ;;  %3865 = vmatpush1.bf16.msra.mxu1 %v6238_v45  ;;  %v6303_v44 = vld [vmem:[%s8920_s3 + $0xb94] ss:$20 sps:$4 sm:$0xff]  }
 0x122   :  { %3823 = vmatprep.subr.bf16.mxu0 %v6243_v46  ;;  %3866 = vmatprep.subr.bf16.mxu1 %v6246_v47  ;;  %v6306_v45 = vld [vmem:[%s8920_s3 + $0xe14] ss:$20 sps:$4 sm:$0xff]   ;;  %v98_v46 = vrot.slane %v7408_v48, %v7179_v31  ;;  %v6301_v47 = vld [vmem:[%s8920_s3 + $0xb90] ss:$20 sps:$4 sm:$0xff]  }
 0x125   :  { %3824 = vmatpush1.bf16.msra.mxu0 %v6241_v33  ;;  %3867 = vmatpush1.bf16.msra.mxu1 %v6244_v51  ;;  %v6304_v33 = vld [vmem:[%s8920_s3 + $0xe10] ss:$20 sps:$4 sm:$0xff]   ;;  %v106_v51 = vrot.slane %v7408_v48, %v7182_v32  ;;  %v6310_v48 = vld [vmem:[%s8920_s3 + $0xde8] ss:$20 sps:$4 sm:$0xff]  }
 0x126   :  { %3825 = vmatprep.subr.bf16.mxu0 %v6249_v52  ;;  %3868 = vmatprep.subr.bf16.mxu1 %v6252_v53  ;;  %v6309_v52 = vld [vmem:[%s8920_s3 + $0xb6c] ss:$20 sps:$4 sm:$0xff]  }
 0x127   :  { %v6312_v53 = vld [vmem:[%s8920_s3 + $0xdec] ss:$20 sps:$4 sm:$0xff]  }
 0x129   :  { %3826 = vmatpush1.bf16.msra.mxu0 %v6247_v54  ;;  %3869 = vmatpush1.bf16.msra.mxu1 %v6250_v55  ;;  %v459_v54 = vadd.f32 %v7371_v24, %v98_v46  ;;  %v6307_v55 = vld [vmem:[%s8920_s3 + $0xb68] ss:$20 sps:$4 sm:$0xff]   ;;  %v6315_v24 = vld [vmem:[%s8920_s3 + $0xb44] ss:$20 sps:$4 sm:$0xff]  }
 0x12a   :  { %3827 = vmatprep.subr.bf16.mxu0 %v6255_v56  ;;  %3870 = vmatprep.subr.bf16.mxu1 %v6258_v57  ;;  %v502_v56 = vadd.f32 %v7373_v25, %v106_v51  ;;  %v463_v57 = vadd.f32 %v7410_v49, %v98_v46  ;;  %v6313_v25 = vld [vmem:[%s8920_s3 + $0xb40] ss:$20 sps:$4 sm:$0xff]  }
 0x12b   :  { %v6316_v49 = vld [vmem:[%s8920_s3 + $0xdc0] ss:$20 sps:$4 sm:$0xff]  }
 0x12c   :  { %v6360_v46 = vld [vmem:[%s8920_s3 + $0x2b4] ss:$20 sps:$4 sm:$0xff]  }
 0x12d   :  { %3828 = vmatpush1.bf16.msra.mxu0 %v6253_v58  ;;  %3871 = vmatpush1.bf16.msra.mxu1 %v6256_v59  ;;  %v506_v58 = vadd.f32 %v7412_v50, %v106_v51  ;;  %v6318_v59 = vld [vmem:[%s8920_s3 + $0xdc4] ss:$20 sps:$4 sm:$0xff]   ;;  %v6363_v51 = vld [vmem:[%s8920_s3 + $0xc] ss:$20 sps:$4 sm:$0xff]  }
 0x12e   :  { %3829 = vmatprep.subr.bf16.mxu0 %v6261_v60  ;;  %3872 = vmatprep.subr.bf16.mxu1 %v6264_v61  ;;  %v6321_v50 = vld [vmem:[%s8920_s3 + $0x124] ss:$20 sps:$4 sm:$0xff]   ;;  %v518_v60 = vmax.f32 %v459_v54, 0.0  ;;  %v520_v61 = vmax.f32 %v502_v56, 0.0  ;;  %v6364_v54 = vld [vmem:[%s8920_s3 + $0x288] ss:$20 sps:$4 sm:$0xff]  }
 0x12f   :  { %v6367_v56 = vld [vmem:[%s8920_s3 + $0x260] ss:$20 sps:$4 sm:$0xff]  }
 0x131   :  { %3830 = vmatpush1.bf16.msra.mxu0 %v6259_v3  ;;  %3873 = vmatpush1.bf16.msra.mxu1 %v6262_v4  ;;  %v530_v3 = vmax.f32 %v463_v57, 0.0  ;;  %v532_v4 = vmax.f32 %v506_v58, 0.0  ;;  %v6370_v57 = vld [vmem:[%s8920_s3 + $0x4e0] ss:$20 sps:$4 sm:$0xff]   ;;  %v6375_v58 = vld [vmem:[%s8920_s3 + $0x23c] ss:$20 sps:$4 sm:$0xff]  }
 0x132   :  { %3831 = vmatprep.subr.bf16.mxu0 %v6267_v62  ;;  %3874 = vmatprep.subr.bf16.mxu1 %v6270_v63  ;;  %v6324_v62 = vld [vmem:[%s8920_s3 + $0x3a4] ss:$20 sps:$4 sm:$0xff]   ;;  %v6319_v63 = vld [vmem:[%s8920_s3 + $0x120] ss:$20 sps:$4 sm:$0xff]  }
 0x135   :  { %3832 = vmatpush1.bf16.msra.mxu0 %v6265_v0  ;;  %3875 = vmatpush1.bf16.msra.mxu1 %v6268_v2  ;;  %v7667_v0 = vpack.c.bf16 %v530_v3, %v518_v60  ;;  %v7669_v2 = vpack.c.bf16 %v532_v4, %v520_v61  ;;  %v6379_v60 = vld [vmem:[%s8920_s3 + $0x210] ss:$20 sps:$4 sm:$0xff]   ;;  %v6387_v3 = vld [vmem:[%s8920_s3 + $0x1ec] ss:$20 sps:$4 sm:$0xff]  }
 0x136   :  { %3833 = vmatprep.subr.bf16.mxu0 %v6273_v19  ;;  %3876 = vmatprep.subr.bf16.mxu1 %v6276_v20  ;;  %v6322_v19 = vld [vmem:[%s8920_s3 + $0x3a0] ss:$20 sps:$4 sm:$0xff]   ;;  %v6327_v20 = vld [vmem:[%s8920_s3 + $0xfc] ss:$20 sps:$4 sm:$0xff]  }
 0x137   :  { %v6382_v61 = vld [vmem:[%s8920_s3 + $0x490] ss:$20 sps:$4 sm:$0xff]   ;;  %v6390_v4 = vld [vmem:[%s8920_s3 + $0x46c] ss:$20 sps:$4 sm:$0xff]  }
 0x139   :  { %3834 = vmatpush2.bf16.msra.mxu0 %v6271_v5  ;;  %3877 = vmatpush2.bf16.msra.mxu1 %v6274_v6  ;;  %v6330_v5 = vld [vmem:[%s8920_s3 + $0x37c] ss:$20 sps:$4 sm:$0xff]   ;;  %v6325_v6 = vld [vmem:[%s8920_s3 + $0xf8] ss:$20 sps:$4 sm:$0xff]  }
 0x13a   :  { %3835 = vmatprep.subr.bf16.mxu0 %v6279_v7  ;;  %3878 = vmatprep.subr.bf16.mxu1 %v6282_v8  ;;  %v6328_v7 = vld [vmem:[%s8920_s3 + $0x378] ss:$20 sps:$4 sm:$0xff]   ;;  %v6333_v8 = vld [vmem:[%s8920_s3 + $0xd4] ss:$20 sps:$4 sm:$0xff]  }
 0x13d   :  { %3836 = vmatpush2.bf16.msra.mxu0 %v6277_v9  ;;  %3879 = vmatpush2.bf16.msra.mxu1 %v6280_v10  ;;  %v6336_v9 = vld [vmem:[%s8920_s3 + $0x354] ss:$20 sps:$4 sm:$0xff]   ;;  %v6331_v10 = vld [vmem:[%s8920_s3 + $0xd0] ss:$20 sps:$4 sm:$0xff]  }
 0x13e   :  { %3837 = vmatprep.subr.bf16.mxu0 %v6285_v13  ;;  %3880 = vmatprep.subr.bf16.mxu1 %v6288_v14  ;;  %v6334_v13 = vld [vmem:[%s8920_s3 + $0x350] ss:$20 sps:$4 sm:$0xff]   ;;  %v6339_v14 = vld [vmem:[%s8920_s3 + $0xac] ss:$20 sps:$4 sm:$0xff]  }
 0x141   :  { %3838 = vmatpush2.bf16.msra.mxu0 %v6283_v17  ;;  %3881 = vmatpush2.bf16.msra.mxu1 %v6286_v18  ;;  %v6342_v17 = vld [vmem:[%s8920_s3 + $0x32c] ss:$20 sps:$4 sm:$0xff]   ;;  %v6337_v18 = vld [vmem:[%s8920_s3 + $0xa8] ss:$20 sps:$4 sm:$0xff]  }
 0x142   :  { %3839 = vmatprep.subr.bf16.mxu0 %v6291_v21  ;;  %3882 = vmatprep.subr.bf16.mxu1 %v6294_v22  ;;  %v6340_v21 = vld [vmem:[%s8920_s3 + $0x328] ss:$20 sps:$4 sm:$0xff]   ;;  %v6345_v22 = vld [vmem:[%s8920_s3 + $0x84] ss:$20 sps:$4 sm:$0xff]  }
 0x145   :  { %3840 = vmatpush2.bf16.msra.mxu0 %v6289_v23  ;;  %3883 = vmatpush2.bf16.msra.mxu1 %v6292_v27  ;;  %v6348_v23 = vld [vmem:[%s8920_s3 + $0x304] ss:$20 sps:$4 sm:$0xff]   ;;  %v6343_v27 = vld [vmem:[%s8920_s3 + $0x80] ss:$20 sps:$4 sm:$0xff]  }
 0x146   :  { %3841 = vmatprep.subr.bf16.mxu0 %v6297_v36  ;;  %3884 = vmatprep.subr.bf16.mxu1 %v6300_v39  ;;  %v6346_v36 = vld [vmem:[%s8920_s3 + $0x300] ss:$20 sps:$4 sm:$0xff]   ;;  %v6351_v39 = vld [vmem:[%s8920_s3 + $0x5c] ss:$20 sps:$4 sm:$0xff]  }
 0x149   :  { %3842 = vmatpush2.bf16.msra.mxu0 %v6295_v40  ;;  %3885 = vmatpush2.bf16.msra.mxu1 %v6298_v43  ;;  %v6354_v40 = vld [vmem:[%s8920_s3 + $0x2dc] ss:$20 sps:$4 sm:$0xff]   ;;  %v6349_v43 = vld [vmem:[%s8920_s3 + $0x58] ss:$20 sps:$4 sm:$0xff]  }
 0x14a   :  { %3843 = vmatprep.subr.bf16.mxu0 %v6303_v44  ;;  %3886 = vmatprep.subr.bf16.mxu1 %v6306_v45  ;;  %v6352_v44 = vld [vmem:[%s8920_s3 + $0x2d8] ss:$20 sps:$4 sm:$0xff]   ;;  %v6357_v45 = vld [vmem:[%s8920_s3 + $0x34] ss:$20 sps:$4 sm:$0xff]  }
 0x14d   :  { %3844 = vmatpush2.bf16.msra.mxu0 %v6301_v47  ;;  %3887 = vmatpush2.bf16.msra.mxu1 %v6304_v33  ;;  %v6355_v47 = vld [vmem:[%s8920_s3 + $0x30] ss:$20 sps:$4 sm:$0xff]  }
 0x14e   :  { %3845 = vmatprep.subr.bf16.mxu0 %v6309_v52  ;;  %3888 = vmatprep.subr.bf16.mxu1 %v6312_v53  ;;  %v6358_v33 = vld [vmem:[%s8920_s3 + $0x2b0] ss:$20 sps:$4 sm:$0xff]   ;;  %v6366_v52 = vld [vmem:[%s8920_s3 + $0x28c] ss:$20 sps:$4 sm:$0xff]   ;;  %v6361_v53 = vld [vmem:[%s8920_s3 + $0x8] ss:$20 sps:$4 sm:$0xff]  }
 0x151   :  { %3846 = vmatpush2.bf16.msra.mxu0 %v6307_v55  ;;  %3889 = vmatpush2.bf16.msra.mxu1 %v6310_v48  ;;  %v6369_v55 = vld [vmem:[%s8920_s3 + $0x264] ss:$20 sps:$4 sm:$0xff]  }
 0x152   :  { %3847 = vmatprep.subr.bf16.mxu0 %v6315_v24  ;;  %3890 = vmatprep.subr.bf16.mxu1 %v6318_v59  ;;  %v6372_v48 = vld [vmem:[%s8920_s3 + $0x4e4] ss:$20 sps:$4 sm:$0xff]   ;;  %v6378_v24 = vld [vmem:[%s8920_s3 + $0x4bc] ss:$20 sps:$4 sm:$0xff]  }
 0x153   :  { %v6373_v59 = vld [vmem:[%s8920_s3 + $0x238] ss:$20 sps:$4 sm:$0xff]  }
 0x155   :  { %3848 = vmatpush2.bf16.msra.mxu0 %v6313_v25  ;;  %3891 = vmatpush2.bf16.msra.mxu1 %v6316_v49  ;;  %v6376_v25 = vld [vmem:[%s8920_s3 + $0x4b8] ss:$20 sps:$4 sm:$0xff]   ;;  %v6381_v49 = vld [vmem:[%s8920_s3 + $0x214] ss:$20 sps:$4 sm:$0xff]  }
 0x156   :  { %3903 = vmatprep.subr.bf16.mxu0 %v6321_v50  ;;  %3946 = vmatprep.subr.bf16.mxu1 %v6324_v62  ;;  %v6384_v50 = vld [vmem:[%s8920_s3 + $0x494] ss:$20 sps:$4 sm:$0xff]  }
 0x157   :  { %v6385_v62 = vld [vmem:[%s8920_s3 + $0x1e8] ss:$20 sps:$4 sm:$0xff]  }
 0x158   :  { %3850 = vmatmul.mubr.bf16.vlgmr.msra.gmra.mxu0 %v7667_v0  ;;  %3893 = vmatmul.mubr.bf16.vlgmr.msra.gmra.mxu1 %v7669_v2 }
 0x159   :  { %3904 = vmatpush1.bf16.msra.mxu0 %v6319_v63  ;;  %3935 = vmatprep.mubr.bf16.mxu0 %v7217_v11  ;;  %v6388_v63 = vld [vmem:[%s8920_s3 + $0x468] ss:$20 sps:$4 sm:$0xff]  }
 0x15a   :  { %3947 = vmatpush1.bf16.msra.mxu1 %v6322_v19  ;;  %3978 = vmatprep.mubr.bf16.mxu1 %v7219_v12  ;;  %v6393_v19 = vld [vmem:[%s8920_s3 + $0x1c4] ss:$20 sps:$4 sm:$0xff]  }
 0x15b   :  { %3905 = vmatprep.subr.bf16.mxu0 %v6327_v20  ;;  %3948 = vmatprep.subr.bf16.mxu1 %v6330_v5  ;;  %v6396_v20 = vld [vmem:[%s8920_s3 + $0x444] ss:$20 sps:$4 sm:$0xff]   ;;  %v6391_v5 = vld [vmem:[%s8920_s3 + $0x1c0] ss:$20 sps:$4 sm:$0xff]  }
 0x15d   :  { %3906 = vmatpush1.bf16.msra.mxu0 %v6325_v6  ;;  %v6394_v6 = vld [vmem:[%s8920_s3 + $0x440] ss:$20 sps:$4 sm:$0xff]  }
 0x15e   :  { %3949 = vmatpush1.bf16.msra.mxu1 %v6328_v7  ;;  %3907 = vmatprep.subr.bf16.mxu0 %v6333_v8  ;;  %v6399_v7 = vld [vmem:[%s8920_s3 + $0x19c] ss:$20 sps:$4 sm:$0xff]  }
 0x15f   :  { %3950 = vmatprep.subr.bf16.mxu1 %v6336_v9  ;;  %v6402_v8 = vld [vmem:[%s8920_s3 + $0x41c] ss:$20 sps:$4 sm:$0xff]   ;;  %v6397_v9 = vld [vmem:[%s8920_s3 + $0x198] ss:$20 sps:$4 sm:$0xff]  }
 0x161   :  { %3908 = vmatpush1.bf16.msra.mxu0 %v6331_v10  ;;  %v6400_v10 = vld [vmem:[%s8920_s3 + $0x418] ss:$20 sps:$4 sm:$0xff]  }
 0x162   :  { %3951 = vmatpush1.bf16.msra.mxu1 %v6334_v13  ;;  %3909 = vmatprep.subr.bf16.mxu0 %v6339_v14  ;;  %v6405_v13 = vld [vmem:[%s8920_s3 + $0x174] ss:$20 sps:$4 sm:$0xff]  }
 0x163   :  { %3952 = vmatprep.subr.bf16.mxu1 %v6342_v17  ;;  %v6408_v14 = vld [vmem:[%s8920_s3 + $0x3f4] ss:$20 sps:$4 sm:$0xff]   ;;  %v6403_v17 = vld [vmem:[%s8920_s3 + $0x170] ss:$20 sps:$4 sm:$0xff]  }
 0x165   :  { %3910 = vmatpush1.bf16.msra.mxu0 %v6337_v18  ;;  %v6406_v18 = vld [vmem:[%s8920_s3 + $0x3f0] ss:$20 sps:$4 sm:$0xff]  }
 0x166   :  { %3953 = vmatpush1.bf16.msra.mxu1 %v6340_v21  ;;  %3911 = vmatprep.subr.bf16.mxu0 %v6345_v22  ;;  %v6411_v21 = vld [vmem:[%s8920_s3 + $0x14c] ss:$20 sps:$4 sm:$0xff]  }
 0x167   :  { %3954 = vmatprep.subr.bf16.mxu1 %v6348_v23  ;;  %v6414_v22 = vld [vmem:[%s8920_s3 + $0x3cc] ss:$20 sps:$4 sm:$0xff]   ;;  %v6409_v23 = vld [vmem:[%s8920_s3 + $0x148] ss:$20 sps:$4 sm:$0xff]  }
 0x169   :  { %3912 = vmatpush1.bf16.msra.mxu0 %v6343_v27  ;;  %v6412_v27 = vld [vmem:[%s8920_s3 + $0x3c8] ss:$20 sps:$4 sm:$0xff]  }
 0x16a   :  { %3955 = vmatpush1.bf16.msra.mxu1 %v6346_v36  ;;  %3913 = vmatprep.subr.bf16.mxu0 %v6351_v39  ;;  %v6417_v36 = vld [vmem:[%s8920_s3 + $0x624] ss:$20 sps:$4 sm:$0xff]  }
 0x16b   :  { %3956 = vmatprep.subr.bf16.mxu1 %v6354_v40  ;;  %v1122_v39 = vld [vmem:[%s8922_s4] sm:$0x1f] }
 0x16c   :  { %v6420_v40 = vld [vmem:[%s8920_s3 + $0x8a4] ss:$20 sps:$4 sm:$0xff]  }
 0x16d   :  { %3914 = vmatpush1.bf16.msra.mxu0 %v6349_v43  ;;  %v6415_v43 = vld [vmem:[%s8920_s3 + $0x620] ss:$20 sps:$4 sm:$0xff]  }
 0x16e   :  { %3957 = vmatpush1.bf16.msra.mxu1 %v6352_v44  ;;  %3915 = vmatprep.subr.bf16.mxu0 %v6357_v45  ;;  %v1127_v44 = vrot.slane %v1122_v39, %v7179_v31  ;;  %v6418_v45 = vld [vmem:[%s8920_s3 + $0x8a0] ss:$20 sps:$4 sm:$0xff]  }
 0x16f   :  { %3958 = vmatprep.subr.bf16.mxu1 %v6360_v46  ;;  %v6423_v46 = vld [vmem:[%s8920_s3 + $0x5fc] ss:$20 sps:$4 sm:$0xff]   ;;  %v6463_v39 = vld [vmem:[%s8920_s3 + $0x760] ss:$20 sps:$4 sm:$0xff]  }
 0x171   :  { %3916 = vmatpush1.bf16.msra.mxu0 %v6355_v47 }
 0x172   :  { %3959 = vmatpush1.bf16.msra.mxu1 %v6358_v33  ;;  %3917 = vmatprep.subr.bf16.mxu0 %v6363_v51  ;;  %v6426_v51 = vld [vmem:[%s8920_s3 + $0x87c] ss:$20 sps:$4 sm:$0xff]  }
 0x173   :  { %3960 = vmatprep.subr.bf16.mxu1 %v6366_v52 }
 0x175   :  { %3918 = vmatpush1.bf16.msra.mxu0 %v6361_v53  ;;  %v6421_v53 = vld [vmem:[%s8920_s3 + $0x5f8] ss:$20 sps:$4 sm:$0xff]  }
 0x176   :  { %3961 = vmatpush1.bf16.msra.mxu1 %v6364_v54  ;;  %3919 = vmatprep.subr.bf16.mxu0 %v6369_v55 }
 0x177   :  { %3962 = vmatprep.subr.bf16.mxu1 %v6372_v48  ;;  %v6424_v48 = vld [vmem:[%s8920_s3 + $0x878] ss:$20 sps:$4 sm:$0xff]  }
 0x179   :  { %3920 = vmatpush2.bf16.msra.mxu0 %v6367_v56  ;;  %v6429_v56 = vld [vmem:[%s8920_s3 + $0x5d4] ss:$20 sps:$4 sm:$0xff]  }
 0x17a   :  { %3963 = vmatpush2.bf16.msra.mxu1 %v6370_v57  ;;  %3921 = vmatprep.subr.bf16.mxu0 %v6375_v58  ;;  %v6432_v58 = vld [vmem:[%s8920_s3 + $0x854] ss:$20 sps:$4 sm:$0xff]  }
 0x17b   :  { %3964 = vmatprep.subr.bf16.mxu1 %v6378_v24 }
 0x17d   :  { %3922 = vmatpush2.bf16.msra.mxu0 %v6373_v59 }
 0x17e   :  { %3965 = vmatpush2.bf16.msra.mxu1 %v6376_v25  ;;  %3923 = vmatprep.subr.bf16.mxu0 %v6381_v49  ;;  %v6427_v25 = vld [vmem:[%s8920_s3 + $0x5d0] ss:$20 sps:$4 sm:$0xff]  }
 0x17f   :  { %3966 = vmatprep.subr.bf16.mxu1 %v6384_v50  ;;  %v6430_v50 = vld [vmem:[%s8920_s3 + $0x850] ss:$20 sps:$4 sm:$0xff]  }
 0x181   :  { %3924 = vmatpush2.bf16.msra.mxu0 %v6379_v60  ;;  %v6435_v60 = vld [vmem:[%s8920_s3 + $0x5ac] ss:$20 sps:$4 sm:$0xff]  }
 0x182   :  { %3967 = vmatpush2.bf16.msra.mxu1 %v6382_v61  ;;  %3925 = vmatprep.subr.bf16.mxu0 %v6387_v3  ;;  %v6438_v3 = vld [vmem:[%s8920_s3 + $0x82c] ss:$20 sps:$4 sm:$0xff]  }
 0x183   :  { %3968 = vmatprep.subr.bf16.mxu1 %v6390_v4  ;;  %v6433_v4 = vld [vmem:[%s8920_s3 + $0x5a8] ss:$20 sps:$4 sm:$0xff]  }
 0x185   :  { %3926 = vmatpush2.bf16.msra.mxu0 %v6385_v62  ;;  %v6436_v62 = vld [vmem:[%s8920_s3 + $0x828] ss:$20 sps:$4 sm:$0xff]  }
 0x186   :  { %3969 = vmatpush2.bf16.msra.mxu1 %v6388_v63  ;;  %3927 = vmatprep.subr.bf16.mxu0 %v6393_v19  ;;  %v6441_v63 = vld [vmem:[%s8920_s3 + $0x584] ss:$20 sps:$4 sm:$0xff]  }
 0x187   :  { %3970 = vmatprep.subr.bf16.mxu1 %v6396_v20  ;;  %v6444_v19 = vld [vmem:[%s8920_s3 + $0x804] ss:$20 sps:$4 sm:$0xff]   ;;  %v6439_v20 = vld [vmem:[%s8920_s3 + $0x580] ss:$20 sps:$4 sm:$0xff]  }
 0x189   :  { %3928 = vmatpush2.bf16.msra.mxu0 %v6391_v5  ;;  %v6442_v5 = vld [vmem:[%s8920_s3 + $0x800] ss:$20 sps:$4 sm:$0xff]  }
 0x18a   :  { %3971 = vmatpush2.bf16.msra.mxu1 %v6394_v6  ;;  %3929 = vmatprep.subr.bf16.mxu0 %v6399_v7  ;;  %v6447_v6 = vld [vmem:[%s8920_s3 + $0x55c] ss:$20 sps:$4 sm:$0xff]  }
 0x18b   :  { %3972 = vmatprep.subr.bf16.mxu1 %v6402_v8  ;;  %v6450_v7 = vld [vmem:[%s8920_s3 + $0x7dc] ss:$20 sps:$4 sm:$0xff]   ;;  %v6445_v8 = vld [vmem:[%s8920_s3 + $0x558] ss:$20 sps:$4 sm:$0xff]  }
 0x18d   :  { %3930 = vmatpush2.bf16.msra.mxu0 %v6397_v9  ;;  %v6448_v9 = vld [vmem:[%s8920_s3 + $0x7d8] ss:$20 sps:$4 sm:$0xff]  }
 0x18e   :  { %3973 = vmatpush2.bf16.msra.mxu1 %v6400_v10  ;;  %3931 = vmatprep.subr.bf16.mxu0 %v6405_v13  ;;  %v6453_v10 = vld [vmem:[%s8920_s3 + $0x534] ss:$20 sps:$4 sm:$0xff]  }
 0x18f   :  { %3974 = vmatprep.subr.bf16.mxu1 %v6408_v14  ;;  %v6456_v13 = vld [vmem:[%s8920_s3 + $0x7b4] ss:$20 sps:$4 sm:$0xff]   ;;  %v6451_v14 = vld [vmem:[%s8920_s3 + $0x530] ss:$20 sps:$4 sm:$0xff]  }
 0x191   :  { %3932 = vmatpush2.bf16.msra.mxu0 %v6403_v17  ;;  %v6454_v17 = vld [vmem:[%s8920_s3 + $0x7b0] ss:$20 sps:$4 sm:$0xff]  }
 0x192   :  { %3975 = vmatpush2.bf16.msra.mxu1 %v6406_v18  ;;  %3933 = vmatprep.subr.bf16.mxu0 %v6411_v21  ;;  %v6459_v18 = vld [vmem:[%s8920_s3 + $0x50c] ss:$20 sps:$4 sm:$0xff]  }
 0x193   :  { %3976 = vmatprep.subr.bf16.mxu1 %v6414_v22  ;;  %v6462_v21 = vld [vmem:[%s8920_s3 + $0x78c] ss:$20 sps:$4 sm:$0xff]   ;;  %v6457_v22 = vld [vmem:[%s8920_s3 + $0x508] ss:$20 sps:$4 sm:$0xff]  }
 0x195   :  { %3934 = vmatpush2.bf16.msra.mxu0 %v6409_v23  ;;  %v6460_v23 = vld [vmem:[%s8920_s3 + $0x788] ss:$20 sps:$4 sm:$0xff]  }
 0x196   :  { %3977 = vmatpush2.bf16.msra.mxu1 %v6412_v27  ;;  %3989 = vmatprep.subr.bf16.mxu0 %v6417_v36  ;;  %v6465_v27 = vld [vmem:[%s8920_s3 + $0x764] ss:$20 sps:$4 sm:$0xff]  }
 0x197   :  { %4032 = vmatprep.subr.bf16.mxu1 %v6420_v40  ;;  %v6468_v36 = vld [vmem:[%s8920_s3 + $0x9e4] ss:$20 sps:$4 sm:$0xff]   ;;  %v6466_v40 = vld [vmem:[%s8920_s3 + $0x9e0] ss:$20 sps:$4 sm:$0xff]  }
 0x198   :  { %3936 = vmatmul.mubr.bf16.vlgmr.msra.gmra.mxu0 %v7221_v15  ;;  %v3679_v47 = vpop.f32.mrf.mxu0  ;;  %v3722_v33 = vpop.f32.mrf.mxu1 }
 0x199   :  { %3979 = vmatmul.mubr.bf16.vlgmr.msra.gmra.mxu1 %v7223_v16  ;;  %v3680_v52 = vadd.f32 %v3679_v47, %v1127_v44  ;;  %3990 = vmatpush1.bf16.msra.mxu0 %v6415_v43  ;;  %v6471_v43 = vld [vmem:[%s8920_s3 + $0x73c] ss:$20 sps:$4 sm:$0xff]   ;;  %v6477_v47 = vld [vmem:[%s8920_s3 + $0x714] ss:$20 sps:$4 sm:$0xff]  }
 0x19a   :  { %4021 = vmatprep.mubr.bf16.mxu0 %v7257_v41  ;;  %4033 = vmatpush1.bf16.msra.mxu1 %v6418_v45  ;;  %v7886_v54 = vpop.f32.mrf.mxu0  ;;  %v7888_v55 = vpop.f32.mrf.mxu1  ;;  %v6469_v45 = vld [vmem:[%s8920_s3 + $0x738] ss:$20 sps:$4 sm:$0xff]  }
 0x19b   :  { %v7896_v57 = vadd.f32 %v3722_v33, %v3680_v52  ;;  %4064 = vmatprep.mubr.bf16.mxu1 %v7259_v42  ;;  %3991 = vmatprep.subr.bf16.mxu0 %v6423_v46  ;;  %v6472_v46 = vld [vmem:[%s8920_s3 + $0x9b8] ss:$20 sps:$4 sm:$0xff]   ;;  %v6480_v33 = vld [vmem:[%s8920_s3 + $0x994] ss:$20 sps:$4 sm:$0xff]   ;;  %v6478_v52 = vld [vmem:[%s8920_s3 + $0x990] ss:$20 sps:$4 sm:$0xff]  }
 0x19c   :  { %4034 = vmatprep.subr.bf16.mxu1 %v6426_v51  ;;  %v3683_v24 = vpop.f32.mrf.mxu0  ;;  %v3726_v49 = vpop.f32.mrf.mxu1  ;;  %v6475_v51 = vld [vmem:[%s8920_s3 + $0x710] ss:$20 sps:$4 sm:$0xff]  }
 0x19d   :  { %v3684_v59 = vadd.f32 %v3683_v24, %v1127_v44  ;;  %3992 = vmatpush1.bf16.msra.mxu0 %v6421_v53  ;;  %v6474_v44 = vld [vmem:[%s8920_s3 + $0x9bc] ss:$20 sps:$4 sm:$0xff]   ;;  %v6483_v53 = vld [vmem:[%s8920_s3 + $0x6ec] ss:$20 sps:$4 sm:$0xff]   ;;  %v6489_v24 = vld [vmem:[%s8920_s3 + $0x6c4] ss:$20 sps:$4 sm:$0xff]  }
 0x19e   :  { %4035 = vmatpush1.bf16.msra.mxu1 %v6424_v48  ;;  %3993 = vmatprep.subr.bf16.mxu0 %v6429_v56  ;;  %v6486_v48 = vld [vmem:[%s8920_s3 + $0x96c] ss:$20 sps:$4 sm:$0xff]   ;;  %v6481_v56 = vld [vmem:[%s8920_s3 + $0x6e8] ss:$20 sps:$4 sm:$0xff]  }
 0x19f   :  { %v7911_v61 = vadd.f32 %v3726_v49, %v3684_v59  ;;  %4036 = vmatprep.subr.bf16.mxu1 %v6432_v58  ;;  %v6484_v58 = vld [vmem:[%s8920_s3 + $0x968] ss:$20 sps:$4 sm:$0xff]   ;;  %v6492_v59 = vld [vmem:[%s8920_s3 + $0x944] ss:$20 sps:$4 sm:$0xff]   ;;  %v6490_v49 = vld [vmem:[%s8920_s3 + $0x940] ss:$20 sps:$4 sm:$0xff]  }
 0x1a1   :  { %3994 = vmatpush1.bf16.msra.mxu0 %v6427_v25  ;;  %v6487_v25 = vld [vmem:[%s8920_s3 + $0x6c0] ss:$20 sps:$4 sm:$0xff]  }
 0x1a2   :  { %4037 = vmatpush1.bf16.msra.mxu1 %v6430_v50  ;;  %3995 = vmatprep.subr.bf16.mxu0 %v6435_v60  ;;  %v6495_v50 = vld [vmem:[%s8920_s3 + $0x69c] ss:$20 sps:$4 sm:$0xff]  }
 0x1a3   :  { %4038 = vmatprep.subr.bf16.mxu1 %v6438_v3  ;;  %v6498_v60 = vld [vmem:[%s8920_s3 + $0x91c] ss:$20 sps:$4 sm:$0xff]   ;;  %v6493_v3 = vld [vmem:[%s8920_s3 + $0x698] ss:$20 sps:$4 sm:$0xff]  }
 0x1a5   :  { %3996 = vmatpush1.bf16.msra.mxu0 %v6433_v4  ;;  %v6496_v4 = vld [vmem:[%s8920_s3 + $0x918] ss:$20 sps:$4 sm:$0xff]  }
 0x1a6   :  { %4039 = vmatpush1.bf16.msra.mxu1 %v6436_v62  ;;  %3997 = vmatprep.subr.bf16.mxu0 %v6441_v63  ;;  %v6501_v62 = vld [vmem:[%s8920_s3 + $0x674] ss:$20 sps:$4 sm:$0xff]  }
 0x1a7   :  { %4040 = vmatprep.subr.bf16.mxu1 %v6444_v19  ;;  %v6504_v63 = vld [vmem:[%s8920_s3 + $0x8f4] ss:$20 sps:$4 sm:$0xff]   ;;  %v6499_v19 = vld [vmem:[%s8920_s3 + $0x670] ss:$20 sps:$4 sm:$0xff]  }
 0x1a9   :  { %3998 = vmatpush1.bf16.msra.mxu0 %v6439_v20  ;;  %v6502_v20 = vld [vmem:[%s8920_s3 + $0x8f0] ss:$20 sps:$4 sm:$0xff]  }
 0x1aa   :  { %4041 = vmatpush1.bf16.msra.mxu1 %v6442_v5  ;;  %3999 = vmatprep.subr.bf16.mxu0 %v6447_v6  ;;  %v6507_v5 = vld [vmem:[%s8920_s3 + $0x64c] ss:$20 sps:$4 sm:$0xff]  }
 0x1ab   :  { %4042 = vmatprep.subr.bf16.mxu1 %v6450_v7  ;;  %v6510_v6 = vld [vmem:[%s8920_s3 + $0x8cc] ss:$20 sps:$4 sm:$0xff]   ;;  %v6505_v7 = vld [vmem:[%s8920_s3 + $0x648] ss:$20 sps:$4 sm:$0xff]  }
 0x1ad   :  { %4000 = vmatpush1.bf16.msra.mxu0 %v6445_v8  ;;  %v6508_v8 = vld [vmem:[%s8920_s3 + $0x8c8] ss:$20 sps:$4 sm:$0xff]  }
 0x1ae   :  { %4043 = vmatpush1.bf16.msra.mxu1 %v6448_v9  ;;  %4001 = vmatprep.subr.bf16.mxu0 %v6453_v10  ;;  %v6513_v9 = vld [vmem:[%s8920_s3 + $0xb24] ss:$20 sps:$4 sm:$0xff]  }
 0x1af   :  { %4044 = vmatprep.subr.bf16.mxu1 %v6456_v13  ;;  %v6516_v10 = vld [vmem:[%s8920_s3 + $0xda4] ss:$20 sps:$4 sm:$0xff]   ;;  %v6511_v13 = vld [vmem:[%s8920_s3 + $0xb20] ss:$20 sps:$4 sm:$0xff]  }
 0x1b1   :  { %4002 = vmatpush1.bf16.msra.mxu0 %v6451_v14  ;;  %v8075_v14 = vpop.f32.mrf.mxu0 }
 0x1b2   :  { %4045 = vmatpush1.bf16.msra.mxu1 %v6454_v17  ;;  %4003 = vmatprep.subr.bf16.mxu0 %v6459_v18  ;;  %v8077_v17 = vpop.f32.mrf.mxu1  ;;  %v6514_v18 = vld [vmem:[%s8920_s3 + $0xda0] ss:$20 sps:$4 sm:$0xff]  }
 0x1b3   :  { %4046 = vmatprep.subr.bf16.mxu1 %v6462_v21  ;;  %v6519_v21 = vld [vmem:[%s8920_s3 + $0xafc] ss:$20 sps:$4 sm:$0xff]  }
 0x1b5   :  { %4004 = vmatpush1.bf16.msra.mxu0 %v6457_v22 }
 0x1b6   :  { %4047 = vmatpush1.bf16.msra.mxu1 %v6460_v23  ;;  %4005 = vmatprep.subr.bf16.mxu0 %v6465_v27  ;;  %v6522_v27 = vld [vmem:[%s8920_s3 + $0xd7c] ss:$20 sps:$4 sm:$0xff]  }
 0x1b7   :  { %4048 = vmatprep.subr.bf16.mxu1 %v6468_v36 }
 0x1b9   :  { %4006 = vmatpush2.bf16.msra.mxu0 %v6463_v39  ;;  %v6517_v39 = vld [vmem:[%s8920_s3 + $0xaf8] ss:$20 sps:$4 sm:$0xff]  }
 0x1ba   :  { %4049 = vmatpush2.bf16.msra.mxu1 %v6466_v40  ;;  %4007 = vmatprep.subr.bf16.mxu0 %v6471_v43 }
 0x1bb   :  { %4050 = vmatprep.subr.bf16.mxu1 %v6474_v44  ;;  %v6520_v44 = vld [vmem:[%s8920_s3 + $0xd78] ss:$20 sps:$4 sm:$0xff]  }
 0x1bd   :  { %4008 = vmatpush2.bf16.msra.mxu0 %v6469_v45 }
 0x1be   :  { %4051 = vmatpush2.bf16.msra.mxu1 %v6472_v46  ;;  %4009 = vmatprep.subr.bf16.mxu0 %v6477_v47  ;;  %v6528_v46 = vld [vmem:[%s8920_s3 + $0xd54] ss:$20 sps:$4 sm:$0xff]  }
 0x1bf   :  { %4052 = vmatprep.subr.bf16.mxu1 %v6480_v33 }
 0x1c1   :  { %4010 = vmatpush2.bf16.msra.mxu0 %v6475_v51  ;;  %v6523_v51 = vld [vmem:[%s8920_s3 + $0xad0] ss:$20 sps:$4 sm:$0xff]  }
 0x1c2   :  { %4053 = vmatpush2.bf16.msra.mxu1 %v6478_v52  ;;  %4011 = vmatprep.subr.bf16.mxu0 %v6483_v53  ;;  %v6526_v53 = vld [vmem:[%s8920_s3 + $0xd50] ss:$20 sps:$4 sm:$0xff]  }
 0x1c3   :  { %4054 = vmatprep.subr.bf16.mxu1 %v6486_v48  ;;  %v6531_v48 = vld [vmem:[%s8920_s3 + $0xaac] ss:$20 sps:$4 sm:$0xff]  }
 0x1c5   :  { %4012 = vmatpush2.bf16.msra.mxu0 %v6481_v56 }
 0x1c6   :  { %4055 = vmatpush2.bf16.msra.mxu1 %v6484_v58  ;;  %4013 = vmatprep.subr.bf16.mxu0 %v6489_v24  ;;  %v6529_v58 = vld [vmem:[%s8920_s3 + $0xaa8] ss:$20 sps:$4 sm:$0xff]  }
 0x1c7   :  { %4056 = vmatprep.subr.bf16.mxu1 %v6492_v59  ;;  %v6532_v24 = vld [vmem:[%s8920_s3 + $0xd28] ss:$20 sps:$4 sm:$0xff]   ;;  %v6537_v59 = vld [vmem:[%s8920_s3 + $0xa84] ss:$20 sps:$4 sm:$0xff]  }
 0x1c9   :  { %4014 = vmatpush2.bf16.msra.mxu0 %v6487_v25  ;;  %v6540_v25 = vld [vmem:[%s8920_s3 + $0xd04] ss:$20 sps:$4 sm:$0xff]  }
 0x1ca   :  { %4057 = vmatpush2.bf16.msra.mxu1 %v6490_v49  ;;  %4015 = vmatprep.subr.bf16.mxu0 %v6495_v50  ;;  %v6535_v49 = vld [vmem:[%s8920_s3 + $0xa80] ss:$20 sps:$4 sm:$0xff]  }
 0x1cb   :  { %4058 = vmatprep.subr.bf16.mxu1 %v6498_v60  ;;  %v6538_v50 = vld [vmem:[%s8920_s3 + $0xd00] ss:$20 sps:$4 sm:$0xff]   ;;  %v6543_v60 = vld [vmem:[%s8920_s3 + $0xa5c] ss:$20 sps:$4 sm:$0xff]  }
 0x1cd   :  { %4016 = vmatpush2.bf16.msra.mxu0 %v6493_v3  ;;  %v6546_v3 = vld [vmem:[%s8920_s3 + $0xcdc] ss:$20 sps:$4 sm:$0xff]  }
 0x1ce   :  { %4059 = vmatpush2.bf16.msra.mxu1 %v6496_v4  ;;  %4017 = vmatprep.subr.bf16.mxu0 %v6501_v62  ;;  %v6541_v4 = vld [vmem:[%s8920_s3 + $0xa58] ss:$20 sps:$4 sm:$0xff]  }
 0x1cf   :  { %4060 = vmatprep.subr.bf16.mxu1 %v6504_v63  ;;  %v6544_v62 = vld [vmem:[%s8920_s3 + $0xcd8] ss:$20 sps:$4 sm:$0xff]   ;;  %v6549_v63 = vld [vmem:[%s8920_s3 + $0xa34] ss:$20 sps:$4 sm:$0xff]  }
 0x1d1   :  { %4018 = vmatpush2.bf16.msra.mxu0 %v6499_v19  ;;  %v6552_v19 = vld [vmem:[%s8920_s3 + $0xcb4] ss:$20 sps:$4 sm:$0xff]  }
 0x1d2   :  { %4061 = vmatpush2.bf16.msra.mxu1 %v6502_v20  ;;  %4019 = vmatprep.subr.bf16.mxu0 %v6507_v5  ;;  %v6547_v20 = vld [vmem:[%s8920_s3 + $0xa30] ss:$20 sps:$4 sm:$0xff]  }
 0x1d3   :  { %4062 = vmatprep.subr.bf16.mxu1 %v6510_v6  ;;  %v6550_v5 = vld [vmem:[%s8920_s3 + $0xcb0] ss:$20 sps:$4 sm:$0xff]   ;;  %v6555_v6 = vld [vmem:[%s8920_s3 + $0xa0c] ss:$20 sps:$4 sm:$0xff]  }
 0x1d5   :  { %4020 = vmatpush2.bf16.msra.mxu0 %v6505_v7  ;;  %v6558_v7 = vld [vmem:[%s8920_s3 + $0xc8c] ss:$20 sps:$4 sm:$0xff]  }
 0x1d6   :  { %4063 = vmatpush2.bf16.msra.mxu1 %v6508_v8  ;;  %4075 = vmatprep.subr.bf16.mxu0 %v6513_v9  ;;  %v6553_v8 = vld [vmem:[%s8920_s3 + $0xa08] ss:$20 sps:$4 sm:$0xff]  }
 0x1d7   :  { %4118 = vmatprep.subr.bf16.mxu1 %v6516_v10  ;;  %v6556_v9 = vld [vmem:[%s8920_s3 + $0xc88] ss:$20 sps:$4 sm:$0xff]   ;;  %v6561_v10 = vld [vmem:[%s8920_s3 + $0xc64] ss:$20 sps:$4 sm:$0xff]  }
 0x1d8   :  { %v3765_v22 = vpop.f32.mrf.mxu0  ;;  %v3808_v23 = vpop.f32.mrf.mxu1  ;;  %4022 = vmatmul.mubr.bf16.vlgmr.msra.gmra.mxu0 %v7464_v28 }
 0x1d9   :  { %v3766_v36 = vadd.f32 %v3765_v22, %v7896_v57  ;;  %4065 = vmatmul.mubr.bf16.vlgmr.msra.gmra.mxu1 %v7466_v29  ;;  %4076 = vmatpush1.bf16.msra.mxu0 %v6511_v13  ;;  %v6525_v57 = vld [vmem:[%s8920_s3 + $0xad4] ss:$20 sps:$4 sm:$0xff]   ;;  %v6564_v13 = vld [vmem:[%s8920_s3 + $0xee4] ss:$20 sps:$4 sm:$0xff]   ;;  %v6567_v22 = vld [vmem:[%s8920_s3 + $0xc3c] ss:$20 sps:$4 sm:$0xff]  }
 0x1da   :  { %4107 = vmatprep.mubr.bf16.mxu0 %v7471_v37  ;;  %4119 = vmatpush1.bf16.msra.mxu1 %v6514_v18  ;;  %v8095_v40 = vpop.f32.mrf.mxu0  ;;  %v8097_v43 = vpop.f32.mrf.mxu1  ;;  %v6559_v18 = vld [vmem:[%s8920_s3 + $0xc60] ss:$20 sps:$4 sm:$0xff]  }
 0x1db   :  { %v8105_v45 = vadd.f32 %v3808_v23, %v3766_v36  ;;  %4150 = vmatprep.mubr.bf16.mxu1 %v7473_v38  ;;  %4077 = vmatprep.subr.bf16.mxu0 %v6519_v21  ;;  %v6562_v21 = vld [vmem:[%s8920_s3 + $0xee0] ss:$20 sps:$4 sm:$0xff]   ;;  %v6570_v23 = vld [vmem:[%s8920_s3 + $0xebc] ss:$20 sps:$4 sm:$0xff]   ;;  %v6568_v36 = vld [vmem:[%s8920_s3 + $0xeb8] ss:$20 sps:$4 sm:$0xff]  }
 0x1dc   :  { %v3769_v47 = vpop.f32.mrf.mxu0  ;;  %4120 = vmatprep.subr.bf16.mxu1 %v6522_v27  ;;  %v3812_v52 = vpop.f32.mrf.mxu1  ;;  %v6565_v27 = vld [vmem:[%s8920_s3 + $0xc38] ss:$20 sps:$4 sm:$0xff]  }
 0x1dd   :  { %v3770_v33 = vadd.f32 %v3769_v47, %v7911_v61  ;;  %4078 = vmatpush1.bf16.msra.mxu0 %v6517_v39  ;;  %v6534_v61 = vld [vmem:[%s8920_s3 + $0xd2c] ss:$20 sps:$4 sm:$0xff]   ;;  %v6573_v39 = vld [vmem:[%s8920_s3 + $0xc14] ss:$20 sps:$4 sm:$0xff]  }
 0x1de   :  { %4121 = vmatpush1.bf16.msra.mxu1 %v6520_v44  ;;  %4079 = vmatprep.subr.bf16.mxu0 %v6525_v57  ;;  %v6576_v44 = vld [vmem:[%s8920_s3 + $0xe94] ss:$20 sps:$4 sm:$0xff]   ;;  %v6571_v57 = vld [vmem:[%s8920_s3 + $0xc10] ss:$20 sps:$4 sm:$0xff]   ;;  %v6579_v47 = vld [vmem:[%s8920_s3 + $0xbec] ss:$20 sps:$4 sm:$0xff]  }
 0x1df   :  { %v8121_v56 = vadd.f32 %v3812_v52, %v3770_v33  ;;  %4122 = vmatprep.subr.bf16.mxu1 %v6528_v46  ;;  %v6574_v46 = vld [vmem:[%s8920_s3 + $0xe90] ss:$20 sps:$4 sm:$0xff]   ;;  %v6582_v33 = vld [vmem:[%s8920_s3 + $0xe6c] ss:$20 sps:$4 sm:$0xff]   ;;  %v6580_v52 = vld [vmem:[%s8920_s3 + $0xe68] ss:$20 sps:$4 sm:$0xff]  }
 0x1e1   :  { %4080 = vmatpush1.bf16.msra.mxu0 %v6523_v51  ;;  %v6577_v51 = vld [vmem:[%s8920_s3 + $0xbe8] ss:$20 sps:$4 sm:$0xff]  }
 0x1e2   :  { %4123 = vmatpush1.bf16.msra.mxu1 %v6526_v53  ;;  %4081 = vmatprep.subr.bf16.mxu0 %v6531_v48  ;;  %v6585_v53 = vld [vmem:[%s8920_s3 + $0xbc4] ss:$20 sps:$4 sm:$0xff]  }
 0x1e3   :  { %4124 = vmatprep.subr.bf16.mxu1 %v6534_v61  ;;  %v6588_v48 = vld [vmem:[%s8920_s3 + $0xe44] ss:$20 sps:$4 sm:$0xff]   ;;  %v6583_v61 = vld [vmem:[%s8920_s3 + $0xbc0] ss:$20 sps:$4 sm:$0xff]  }
 0x1e5   :  { %4082 = vmatpush1.bf16.msra.mxu0 %v6529_v58  ;;  %v6586_v58 = vld [vmem:[%s8920_s3 + $0xe40] ss:$20 sps:$4 sm:$0xff]  }
 0x1e6   :  { %4125 = vmatpush1.bf16.msra.mxu1 %v6532_v24  ;;  %4083 = vmatprep.subr.bf16.mxu0 %v6537_v59  ;;  %v6591_v24 = vld [vmem:[%s8920_s3 + $0xb9c] ss:$20 sps:$4 sm:$0xff]  }
 0x1e7   :  { %4126 = vmatprep.subr.bf16.mxu1 %v6540_v25  ;;  %v6594_v59 = vld [vmem:[%s8920_s3 + $0xe1c] ss:$20 sps:$4 sm:$0xff]   ;;  %v6589_v25 = vld [vmem:[%s8920_s3 + $0xb98] ss:$20 sps:$4 sm:$0xff]  }
 0x1e9   :  { %4084 = vmatpush1.bf16.msra.mxu0 %v6535_v49  ;;  %v6592_v49 = vld [vmem:[%s8920_s3 + $0xe18] ss:$20 sps:$4 sm:$0xff]  }
 0x1ea   :  { %4127 = vmatpush1.bf16.msra.mxu1 %v6538_v50  ;;  %4085 = vmatprep.subr.bf16.mxu0 %v6543_v60  ;;  %v6597_v50 = vld [vmem:[%s8920_s3 + $0xb74] ss:$20 sps:$4 sm:$0xff]  }
 0x1eb   :  { %4128 = vmatprep.subr.bf16.mxu1 %v6546_v3  ;;  %v6600_v60 = vld [vmem:[%s8920_s3 + $0xdf4] ss:$20 sps:$4 sm:$0xff]   ;;  %v6595_v3 = vld [vmem:[%s8920_s3 + $0xb70] ss:$20 sps:$4 sm:$0xff]  }
 0x1ed   :  { %4086 = vmatpush1.bf16.msra.mxu0 %v6541_v4  ;;  %v6598_v4 = vld [vmem:[%s8920_s3 + $0xdf0] ss:$20 sps:$4 sm:$0xff]  }
 0x1ee   :  { %4129 = vmatpush1.bf16.msra.mxu1 %v6544_v62  ;;  %4087 = vmatprep.subr.bf16.mxu0 %v6549_v63  ;;  %v6603_v62 = vld [vmem:[%s8920_s3 + $0xb4c] ss:$20 sps:$4 sm:$0xff]  }
 0x1ef   :  { %4130 = vmatprep.subr.bf16.mxu1 %v6552_v19  ;;  %v6606_v63 = vld [vmem:[%s8920_s3 + $0xdcc] ss:$20 sps:$4 sm:$0xff]   ;;  %v6601_v19 = vld [vmem:[%s8920_s3 + $0xb48] ss:$20 sps:$4 sm:$0xff]  }
 0x1f1   :  { %4088 = vmatpush1.bf16.msra.mxu0 %v6547_v20  ;;  %v6604_v20 = vld [vmem:[%s8920_s3 + $0xdc8] ss:$20 sps:$4 sm:$0xff]  }
 0x1f2   :  { %4131 = vmatpush1.bf16.msra.mxu1 %v6550_v5  ;;  %4089 = vmatprep.subr.bf16.mxu0 %v6555_v6  ;;  %v6607_v5 = vld [vmem:[%s8920_s3 + $0x268] ss:$20 sps:$4 sm:$0xff]  }
 0x1f3   :  { %4132 = vmatprep.subr.bf16.mxu1 %v6558_v7  ;;  %v6608_v6 = vld [vmem:[%s8920_s3 + $0x4e8] ss:$20 sps:$4 sm:$0xff]  }
 0x1f4   :  { %v6609_v7 = vld [vmem:[%s8920_s3 + $0x128] ss:$20 sps:$4 sm:$0xff]  }
 0x1f5   :  { %4090 = vmatpush1.bf16.msra.mxu0 %v6553_v8  ;;  %v6610_v8 = vld [vmem:[%s8920_s3 + $0x3a8] ss:$20 sps:$4 sm:$0xff]  }
 0x1f6   :  { %4133 = vmatpush1.bf16.msra.mxu1 %v6556_v9  ;;  %4091 = vmatprep.subr.bf16.mxu0 %v6561_v10  ;;  %v6611_v9 = vld [vmem:[%s8920_s3 + $0x240] ss:$20 sps:$4 sm:$0xff]   ;;  %v8291_v10 = vpop.f32.mrf.mxu0 }
 0x1f7   :  { %4134 = vmatprep.subr.bf16.mxu1 %v6564_v13  ;;  %v8293_v13 = vpop.f32.mrf.mxu1 }
 0x1f9   :  { %4092 = vmatpush2.bf16.msra.mxu0 %v6559_v18 }
 0x1fa   :  { %4135 = vmatpush2.bf16.msra.mxu1 %v6562_v21  ;;  %4093 = vmatprep.subr.bf16.mxu0 %v6567_v22  ;;  %v6612_v22 = vld [vmem:[%s8920_s3 + $0x4c0] ss:$20 sps:$4 sm:$0xff]  }
 0x1fb   :  { %4136 = vmatprep.subr.bf16.mxu1 %v6570_v23 }
 0x1fd   :  { %4094 = vmatpush2.bf16.msra.mxu0 %v6565_v27  ;;  %v6613_v27 = vld [vmem:[%s8920_s3 + $0x100] ss:$20 sps:$4 sm:$0xff]  }
 0x1fe   :  { %4137 = vmatpush2.bf16.msra.mxu1 %v6568_v36  ;;  %4095 = vmatprep.subr.bf16.mxu0 %v6573_v39 }
 0x1ff   :  { %4138 = vmatprep.subr.bf16.mxu1 %v6576_v44  ;;  %v6614_v44 = vld [vmem:[%s8920_s3 + $0x380] ss:$20 sps:$4 sm:$0xff]  }
 0x201   :  { %4096 = vmatpush2.bf16.msra.mxu0 %v6571_v57 }
 0x202   :  { %4139 = vmatpush2.bf16.msra.mxu1 %v6574_v46  ;;  %4097 = vmatprep.subr.bf16.mxu0 %v6579_v47 }
 0x203   :  { %4140 = vmatprep.subr.bf16.mxu1 %v6582_v33  ;;  %v6617_v33 = vld [vmem:[%s8920_s3 + $0xd8] ss:$20 sps:$4 sm:$0xff]  }
 0x205   :  { %4098 = vmatpush2.bf16.msra.mxu0 %v6577_v51 }
 0x206   :  { %4141 = vmatpush2.bf16.msra.mxu1 %v6580_v52  ;;  %4099 = vmatprep.subr.bf16.mxu0 %v6585_v53  ;;  %v6619_v52 = vld [vmem:[%s8920_s3 + $0x1f0] ss:$20 sps:$4 sm:$0xff]  }
 0x207   :  { %4142 = vmatprep.subr.bf16.mxu1 %v6588_v48 }
 0x209   :  { %4100 = vmatpush2.bf16.msra.mxu0 %v6583_v61 }
 0x20a   :  { %4143 = vmatpush2.bf16.msra.mxu1 %v6586_v58  ;;  %4101 = vmatprep.subr.bf16.mxu0 %v6591_v24  ;;  %v6621_v58 = vld [vmem:[%s8920_s3 + $0xb0] ss:$20 sps:$4 sm:$0xff]  }
 0x20b   :  { %4144 = vmatprep.subr.bf16.mxu1 %v6594_v59  ;;  %v6622_v24 = vld [vmem:[%s8920_s3 + $0x330] ss:$20 sps:$4 sm:$0xff]   ;;  %v6623_v59 = vld [vmem:[%s8920_s3 + $0x1c8] ss:$20 sps:$4 sm:$0xff]  }
 0x20d   :  { %4102 = vmatpush2.bf16.msra.mxu0 %v6589_v25 }
 0x20e   :  { %4145 = vmatpush2.bf16.msra.mxu1 %v6592_v49  ;;  %4103 = vmatprep.subr.bf16.mxu0 %v6597_v50  ;;  %v6624_v49 = vld [vmem:[%s8920_s3 + $0x448] ss:$20 sps:$4 sm:$0xff]  }
 0x20f   :  { %4146 = vmatprep.subr.bf16.mxu1 %v6600_v60  ;;  %v6625_v50 = vld [vmem:[%s8920_s3 + $0x88] ss:$20 sps:$4 sm:$0xff]  }
 0x210   :  { %v6626_v60 = vld [vmem:[%s8920_s3 + $0x308] ss:$20 sps:$4 sm:$0xff]  }
 0x211   :  { %4104 = vmatpush2.bf16.msra.mxu0 %v6595_v3  ;;  %v6627_v3 = vld [vmem:[%s8920_s3 + $0x1a0] ss:$20 sps:$4 sm:$0xff]  }
 0x212   :  { %4147 = vmatpush2.bf16.msra.mxu1 %v6598_v4  ;;  %4105 = vmatprep.subr.bf16.mxu0 %v6603_v62  ;;  %v6628_v4 = vld [vmem:[%s8920_s3 + $0x420] ss:$20 sps:$4 sm:$0xff]  }
 0x213   :  { %4148 = vmatprep.subr.bf16.mxu1 %v6606_v63  ;;  %v6629_v62 = vld [vmem:[%s8920_s3 + $0x60] ss:$20 sps:$4 sm:$0xff]  }
 0x214   :  { %v6630_v63 = vld [vmem:[%s8920_s3 + $0x2e0] ss:$20 sps:$4 sm:$0xff]  }
 0x215   :  { %4106 = vmatpush2.bf16.msra.mxu0 %v6601_v19  ;;  %v6631_v19 = vld [vmem:[%s8920_s3 + $0x178] ss:$20 sps:$4 sm:$0xff]  }
 0x216   :  { %4149 = vmatpush2.bf16.msra.mxu1 %v6604_v20  ;;  %5839 = vmatprep.subr.bf16.mxu0 %v6607_v5  ;;  %v6632_v20 = vld [vmem:[%s8920_s3 + $0x3f8] ss:$20 sps:$4 sm:$0xff]  }
 0x217   :  { %5861 = vmatprep.subr.bf16.mxu1 %v6608_v6  ;;  %v6633_v5 = vld [vmem:[%s8920_s3 + $0x38] ss:$20 sps:$4 sm:$0xff]  }
 0x218   :  { %v3851_v18 = vpop.f32.mrf.mxu0  ;;  %v3894_v21 = vpop.f32.mrf.mxu1  ;;  %4108 = vmatmul.mubr.bf16.vlgmr.msra.gmra.mxu0 %v7667_v0  ;;  %v6634_v6 = vld [vmem:[%s8920_s3 + $0x2b8] ss:$20 sps:$4 sm:$0xff]  }
 0x219   :  { %v3852_v23 = vadd.f32 %v3851_v18, %v8105_v45  ;;  %4151 = vmatmul.mubr.bf16.vlgmr.msra.gmra.mxu1 %v7669_v2  ;;  %5840 = vmatpush3.bf16.msra.mxu0 %v6609_v7  ;;  %v6615_v45 = vld [vmem:[%s8920_s3 + $0x218] ss:$20 sps:$4 sm:$0xff]   ;;  %v6635_v7 = vld [vmem:[%s8920_s3 + $0x150] ss:$20 sps:$4 sm:$0xff]  }
 0x21a   :  { %4193 = vmatprep.mubr.bf16.mxu0 %v7217_v11  ;;  %5862 = vmatpush3.bf16.msra.mxu1 %v6610_v8  ;;  %v8305_v36 = vpop.f32.mrf.mxu0  ;;  %v8307_v39 = vpop.f32.mrf.mxu1  ;;  %v6616_v11 = vld [vmem:[%s8920_s3 + $0x498] ss:$20 sps:$4 sm:$0xff]   ;;  %v6636_v8 = vld [vmem:[%s8920_s3 + $0x3d0] ss:$20 sps:$4 sm:$0xff]  }
 0x21b   :  { %v3895_v57 = vadd.f32 %v3894_v21, %v3852_v23  ;;  %4234 = vmatprep.mubr.bf16.mxu1 %v7219_v12  ;;  %5841 = vmatprep.subr.bf16.mxu0 %v6611_v9  ;;  %v6618_v12 = vld [vmem:[%s8920_s3 + $0x358] ss:$20 sps:$4 sm:$0xff]   ;;  %v6637_v9 = vld [vmem:[%s8920_s3 + $0x10] ss:$20 sps:$4 sm:$0xff]   ;;  %v6639_v21 = vld [vmem:[%s8920_s3 + $0x768] ss:$20 sps:$4 sm:$0xff]  }
 0x21c   :  { %v3855_v46 = vpop.f32.mrf.mxu0  ;;  %5863 = vmatprep.subr.bf16.mxu1 %v6612_v22  ;;  %v3898_v51 = vpop.f32.mrf.mxu1  ;;  %v6638_v18 = vld [vmem:[%s8920_s3 + $0x290] ss:$20 sps:$4 sm:$0xff]   ;;  %v6640_v22 = vld [vmem:[%s8920_s3 + $0x9e8] ss:$20 sps:$4 sm:$0xff]  }
 0x21d   :  { %v3856_v47 = vadd.f32 %v3855_v46, %v8121_v56  ;;  %5842 = vmatpush3.bf16.msra.mxu0 %v6613_v27  ;;  %v6620_v56 = vld [vmem:[%s8920_s3 + $0x470] ss:$20 sps:$4 sm:$0xff]   ;;  %v4407_v48 = vmax.f32 %v3895_v57, 0.0  ;;  %v6641_v23 = vld [vmem:[%s8920_s3 + $0x628] ss:$20 sps:$4 sm:$0xff]  }
 0x21e   :  { %5864 = vmatpush3.bf16.msra.mxu1 %v6614_v44  ;;  %5843 = vmatprep.subr.bf16.mxu0 %v6615_v45  ;;  %v6642_v27 = vld [vmem:[%s8920_s3 + $0x8a8] ss:$20 sps:$4 sm:$0xff]   ;;  %v6643_v44 = vld [vmem:[%s8920_s3 + $0x740] ss:$20 sps:$4 sm:$0xff]   ;;  %v6650_v46 = vld [vmem:[%s8920_s3 + $0x858] ss:$20 sps:$4 sm:$0xff]  }
 0x21f   :  { %v3899_v53 = vadd.f32 %v3898_v51, %v3856_v47  ;;  %5865 = vmatprep.subr.bf16.mxu1 %v6616_v11  ;;  %v6644_v45 = vld [vmem:[%s8920_s3 + $0x9c0] ss:$20 sps:$4 sm:$0xff]   ;;  %v6652_v47 = vld [vmem:[%s8920_s3 + $0x970] ss:$20 sps:$4 sm:$0xff]  }
 0x220   :  { %v6645_v57 = vld [vmem:[%s8920_s3 + $0x600] ss:$20 sps:$4 sm:$0xff]   ;;  %v6654_v51 = vld [vmem:[%s8920_s3 + $0x830] ss:$20 sps:$4 sm:$0xff]  }
 0x221   :  { %v4412_v61 = vmax.f32 %v3899_v53, 0.0  ;;  %5844 = vmatpush3.bf16.msra.mxu0 %v6617_v33  ;;  %v6646_v11 = vld [vmem:[%s8920_s3 + $0x880] ss:$20 sps:$4 sm:$0xff]   ;;  %v6653_v33 = vld [vmem:[%s8920_s3 + $0x5b0] ss:$20 sps:$4 sm:$0xff]  }
 0x222   :  { %5866 = vmatpush3.bf16.msra.mxu1 %v6618_v12  ;;  %5845 = vmatprep.subr.bf16.mxu0 %v6619_v52  ;;  %v6655_v12 = vld [vmem:[%s8920_s3 + $0x6c8] ss:$20 sps:$4 sm:$0xff]  }
 0x223   :  { %v8341_v25 = vpack.c.bf16 %v4412_v61, %v4407_v48  ;;  %5867 = vmatprep.subr.bf16.mxu1 %v6620_v56  ;;  %v6656_v52 = vld [vmem:[%s8920_s3 + $0x948] ss:$20 sps:$4 sm:$0xff]   ;;  %v6659_v48 = vld [vmem:[%s8920_s3 + $0x6a0] ss:$20 sps:$4 sm:$0xff]  }
 0x224   :  { %v6657_v53 = vld [vmem:[%s8920_s3 + $0x588] ss:$20 sps:$4 sm:$0xff]   ;;  %v6660_v61 = vld [vmem:[%s8920_s3 + $0x920] ss:$20 sps:$4 sm:$0xff]  }
 0x225   :  { %5846 = vmatpush3.bf16.msra.mxu0 %v6621_v58  ;;  %v6658_v56 = vld [vmem:[%s8920_s3 + $0x808] ss:$20 sps:$4 sm:$0xff]   ;;  %v6661_v58 = vld [vmem:[%s8920_s3 + $0x560] ss:$20 sps:$4 sm:$0xff]  }
 0x226   :  { %5868 = vmatpush3.bf16.msra.mxu1 %v6622_v24  ;;  %5847 = vmatprep.subr.bf16.mxu0 %v6623_v59  ;;  %v6662_v24 = vld [vmem:[%s8920_s3 + $0x7e0] ss:$20 sps:$4 sm:$0xff]   ;;  %v6663_v59 = vld [vmem:[%s8920_s3 + $0x678] ss:$20 sps:$4 sm:$0xff]  }
 0x227   :  { %5869 = vmatprep.subr.bf16.mxu1 %v6624_v49  ;;  %v6664_v49 = vld [vmem:[%s8920_s3 + $0x8f8] ss:$20 sps:$4 sm:$0xff]  }
 0x229   :  { %5848 = vmatpush3.bf16.msra.mxu0 %v6625_v50  ;;  %v6665_v50 = vld [vmem:[%s8920_s3 + $0x538] ss:$20 sps:$4 sm:$0xff]  }
 0x22a   :  { %5870 = vmatpush3.bf16.msra.mxu1 %v6626_v60  ;;  %5849 = vmatprep.subr.bf16.mxu0 %v6627_v3  ;;  %v6666_v60 = vld [vmem:[%s8920_s3 + $0x7b8] ss:$20 sps:$4 sm:$0xff]   ;;  %v6667_v3 = vld [vmem:[%s8920_s3 + $0x650] ss:$20 sps:$4 sm:$0xff]  }
 0x22b   :  { %5871 = vmatprep.subr.bf16.mxu1 %v6628_v4  ;;  %v6668_v4 = vld [vmem:[%s8920_s3 + $0x8d0] ss:$20 sps:$4 sm:$0xff]  }
 0x22d   :  { %5850 = vmatpush3.bf16.msra.mxu0 %v6629_v62  ;;  %v6669_v62 = vld [vmem:[%s8920_s3 + $0x510] ss:$20 sps:$4 sm:$0xff]  }
 0x22e   :  { %5872 = vmatpush3.bf16.msra.mxu1 %v6630_v63  ;;  %5851 = vmatprep.subr.bf16.mxu0 %v6631_v19  ;;  %v6670_v63 = vld [vmem:[%s8920_s3 + $0x790] ss:$20 sps:$4 sm:$0xff]   ;;  %v6671_v19 = vld [vmem:[%s8920_s3 + $0xc68] ss:$20 sps:$4 sm:$0xff]  }
 0x22f   :  { %5873 = vmatprep.subr.bf16.mxu1 %v6632_v20  ;;  %v6672_v20 = vld [vmem:[%s8920_s3 + $0xee8] ss:$20 sps:$4 sm:$0xff]  }
 0x231   :  { %5852 = vmatpush3.bf16.msra.mxu0 %v6633_v5  ;;  %v6673_v5 = vld [vmem:[%s8920_s3 + $0xb28] ss:$20 sps:$4 sm:$0xff]  }
 0x232   :  { %5874 = vmatpush3.bf16.msra.mxu1 %v6634_v6  ;;  %5853 = vmatprep.subr.bf16.mxu0 %v6635_v7  ;;  %v6674_v6 = vld [vmem:[%s8920_s3 + $0xda8] ss:$20 sps:$4 sm:$0xff]   ;;  %v6675_v7 = vld [vmem:[%s8920_s3 + $0xc40] ss:$20 sps:$4 sm:$0xff]  }
 0x233   :  { %5875 = vmatprep.subr.bf16.mxu1 %v6636_v8  ;;  %v6676_v8 = vld [vmem:[%s8920_s3 + $0xec0] ss:$20 sps:$4 sm:$0xff]  }
 0x235   :  { %5854 = vmatpush3.bf16.msra.mxu0 %v6637_v9  ;;  %v6677_v9 = vld [vmem:[%s8920_s3 + $0xb00] ss:$20 sps:$4 sm:$0xff]  }
 0x236   :  { %5876 = vmatpush3.bf16.msra.mxu1 %v6638_v18  ;;  %5883 = vmatprep.subr.bf16.mxu0 %v6639_v21  ;;  %v6678_v18 = vld [vmem:[%s8920_s3 + $0xd80] ss:$20 sps:$4 sm:$0xff]  }
 0x237   :  { %5905 = vmatprep.subr.bf16.mxu1 %v6640_v22  ;;  %v8528_v21 = vld [vmem:[%s8922_s4] sm:$0x1f] }
 0x238   :  { %4194 = vmatmul.mubr.bf16.vlgmr.msra.gmra.mxu0 %v7221_v15  ;;  %v6647_v15 = vld [vmem:[%s8920_s3 + $0x718] ss:$20 sps:$4 sm:$0xff]   ;;  %v1131_v22 = vrot.slane %v8528_v21, %v7190_v34 }
 0x239   :  { %4235 = vmatmul.mubr.bf16.vlgmr.msra.gmra.mxu1 %v7223_v16  ;;  %5884 = vmatpush3.bf16.msra.mxu0 %v6641_v23  ;;  %v6648_v16 = vld [vmem:[%s8920_s3 + $0x998] ss:$20 sps:$4 sm:$0xff]   ;;  %v6683_v23 = vld [vmem:[%s8920_s3 + $0xbf0] ss:$20 sps:$4 sm:$0xff]  }
 0x23a   :  { %4275 = vmatprep.mubr.bf16.mxu0 %v7257_v41  ;;  %5906 = vmatpush3.bf16.msra.mxu1 %v6642_v27  ;;  %v6649_v41 = vld [vmem:[%s8920_s3 + $0x5d8] ss:$20 sps:$4 sm:$0xff]   ;;  %v6684_v27 = vld [vmem:[%s8920_s3 + $0xe70] ss:$20 sps:$4 sm:$0xff]  }
 0x23b   :  { %4316 = vmatprep.mubr.bf16.mxu1 %v7259_v42  ;;  %5885 = vmatprep.subr.bf16.mxu0 %v6643_v44  ;;  %v6651_v42 = vld [vmem:[%s8920_s3 + $0x6f0] ss:$20 sps:$4 sm:$0xff]   ;;  %v3686_v44 = vadd.f32 %v8075_v14, %v1131_v22  ;;  %v6688_v14 = vld [vmem:[%s8920_s3 + $0xe48] ss:$20 sps:$4 sm:$0xff]  }
 0x23c   :  { %5907 = vmatprep.subr.bf16.mxu1 %v6644_v45  ;;  %v6685_v45 = vld [vmem:[%s8920_s3 + $0xab0] ss:$20 sps:$4 sm:$0xff]  }
 0x23d   :  { %5886 = vmatpush3.bf16.msra.mxu0 %v6645_v57  ;;  %v3682_v57 = vadd.f32 %v7886_v54, %v1131_v22  ;;  %v6689_v54 = vld [vmem:[%s8920_s3 + $0xa88] ss:$20 sps:$4 sm:$0xff]  }
 0x23e   :  { %5908 = vmatpush3.bf16.msra.mxu1 %v6646_v11  ;;  %5887 = vmatprep.subr.bf16.mxu0 %v6647_v15  ;;  %v6686_v11 = vld [vmem:[%s8920_s3 + $0xd30] ss:$20 sps:$4 sm:$0xff]   ;;  %v6687_v15 = vld [vmem:[%s8920_s3 + $0xbc8] ss:$20 sps:$4 sm:$0xff]  }
 0x23f   :  { %5909 = vmatprep.subr.bf16.mxu1 %v6648_v16  ;;  %v3729_v16 = vadd.f32 %v8077_v17, %v3686_v44  ;;  %v6692_v17 = vld [vmem:[%s8920_s3 + $0xe20] ss:$20 sps:$4 sm:$0xff]   ;;  %v6763_v44 = vld [vmem:[%s8923_s5 + $0x130] ss:$8 sps:$4 sm:$0xff]  }
 0x240   :  { %v6760_v22 = vld [vmem:[%s8923_s5 + $0x140] ss:$8 sps:$4 sm:$0xff]  }
 0x241   :  { %5888 = vmatpush3.bf16.msra.mxu0 %v6649_v41  ;;  %v3725_v41 = vadd.f32 %v7888_v55, %v3682_v57  ;;  %v3857_v55 = vpop.f32.mrf.mxu0  ;;  %v6718_v57 = vld [vmem:[%s8923_s5 + $0x20] ss:$8 sps:$4 sm:$0xff]  }
 0x242   :  { %5910 = vmatpush3.bf16.msra.mxu1 %v6650_v46  ;;  %5889 = vmatprep.subr.bf16.mxu0 %v6651_v42  ;;  %v3772_v46 = vadd.f32 %v8291_v10, %v3729_v16  ;;  %v6690_v42 = vld [vmem:[%s8920_s3 + $0xd08] ss:$20 sps:$4 sm:$0xff]   ;;  %v6693_v10 = vld [vmem:[%s8920_s3 + $0xa60] ss:$20 sps:$4 sm:$0xff]   ;;  %v6721_v16 = vld [vmem:[%s8923_s5 + $0x10] ss:$8 sps:$4 sm:$0xff]  }
 0x243   :  { %5911 = vmatprep.subr.bf16.mxu1 %v6652_v47  ;;  %v6691_v47 = vld [vmem:[%s8920_s3 + $0xba0] ss:$20 sps:$4 sm:$0xff]  }
 0x245   :  { %5890 = vmatpush3.bf16.msra.mxu0 %v6653_v33  ;;  %v3768_v33 = vadd.f32 %v8095_v40, %v3725_v41  ;;  %v6696_v40 = vld [vmem:[%s8920_s3 + $0xdf8] ss:$20 sps:$4 sm:$0xff]  }
 0x246   :  { %5912 = vmatpush3.bf16.msra.mxu1 %v6654_v51  ;;  %5891 = vmatprep.subr.bf16.mxu0 %v6655_v12  ;;  %v3815_v51 = vadd.f32 %v8293_v13, %v3772_v46  ;;  %v6694_v12 = vld [vmem:[%s8920_s3 + $0xce0] ss:$20 sps:$4 sm:$0xff]   ;;  %v6697_v13 = vld [vmem:[%s8920_s3 + $0xa38] ss:$20 sps:$4 sm:$0xff]  }
 0x247   :  { %5913 = vmatprep.subr.bf16.mxu1 %v6656_v52  ;;  %v6695_v52 = vld [vmem:[%s8920_s3 + $0xb78] ss:$20 sps:$4 sm:$0xff]  }
 0x248   :  { %v6769_v41 = vld [vmem:[%s8923_s5 + $0x110] ss:$8 sps:$4 sm:$0xff]   ;;  %v6774_v46 = vld [vmem:[%s8923_s5 + $0x104] ss:$8 sps:$4 sm:$0xff]  }
 0x249   :  { %5892 = vmatpush3.bf16.msra.mxu0 %v6657_v53  ;;  %v3811_v53 = vadd.f32 %v8097_v43, %v3768_v33  ;;  %v6700_v43 = vld [vmem:[%s8920_s3 + $0xdd0] ss:$20 sps:$4 sm:$0xff]   ;;  %v6777_v33 = vld [vmem:[%s8923_s5 + $0x1f4] ss:$8 sps:$4 sm:$0xff]  }
 0x24a   :  { %5914 = vmatpush3.bf16.msra.mxu1 %v6658_v56  ;;  %5893 = vmatprep.subr.bf16.mxu0 %v6659_v48  ;;  %v3858_v56 = vadd.f32 %v3857_v55, %v3815_v51  ;;  %v6727_v55 = vld [vmem:[%s8923_s5 + $0xf0] ss:$8 sps:$4 sm:$0xff]  }
 0x24b   :  { %5915 = vmatprep.subr.bf16.mxu1 %v6660_v61  ;;  %v3854_v48 = vadd.f32 %v8305_v36, %v3811_v53  ;;  %v6698_v61 = vld [vmem:[%s8920_s3 + $0xcb8] ss:$20 sps:$4 sm:$0xff]   ;;  %v6701_v36 = vld [vmem:[%s8920_s3 + $0xa10] ss:$20 sps:$4 sm:$0xff]   ;;  %v6778_v53 = vld [vmem:[%s8923_s5 + $0x1e0] ss:$8 sps:$4 sm:$0xff]  }
 0x24c   :  { %v6775_v51 = vld [vmem:[%s8923_s5 + $0x1f0] ss:$8 sps:$4 sm:$0xff]  }
 0x24d   :  { %5894 = vmatpush3.bf16.msra.mxu0 %v6661_v58  ;;  %v6699_v58 = vld [vmem:[%s8920_s3 + $0xb50] ss:$20 sps:$4 sm:$0xff]  }
 0x24e   :  { %5916 = vmatpush3.bf16.msra.mxu1 %v6662_v24  ;;  %5895 = vmatprep.subr.bf16.mxu0 %v6663_v59  ;;  %v3900_v24 = vpop.f32.mrf.mxu1 }
 0x24f   :  { %5917 = vmatprep.subr.bf16.mxu1 %v6664_v49  ;;  %v3901_v59 = vadd.f32 %v3900_v24, %v3858_v56  ;;  %v3897_v49 = vadd.f32 %v8307_v39, %v3854_v48  ;;  %v6703_v39 = vld [vmem:[%s8923_s5 + $0x70] ss:$8 sps:$4 sm:$0xff]   ;;  %v6783_v56 = vld [vmem:[%s8923_s5 + $0x1d4] ss:$8 sps:$4 sm:$0xff]   ;;  %v6738_v48 = vld [vmem:[%s8923_s5 + $0xc4] ss:$8 sps:$4 sm:$0xff]  }
 0x250   :  { %v6736_v24 = vld [vmem:[%s8923_s5 + $0xc0] ss:$8 sps:$4 sm:$0xff]  }
 0x251   :  { %5896 = vmatpush3.bf16.msra.mxu0 %v6665_v50  ;;  %v6702_v50 = vld [vmem:[%s8920_s3 + $0xc90] ss:$20 sps:$4 sm:$0xff]  }
 0x252   :  { %5918 = vmatpush3.bf16.msra.mxu1 %v6666_v60  ;;  %5897 = vmatprep.subr.bf16.mxu0 %v6667_v3  ;;  %v6705_v60 = vld [vmem:[%s8923_s5 + $0x74] ss:$8 sps:$4 sm:$0xff]  }
 0x253   :  { %5919 = vmatprep.subr.bf16.mxu1 %v6668_v4  ;;  %v6744_v3 = vld [vmem:[%s8923_s5 + $0x174] ss:$8 sps:$4 sm:$0xff]   ;;  %v4413_v4 = vmax.f32 %v3901_v59, 0.0  ;;  %v6784_v59 = vld [vmem:[%s8923_s5 + $0x1c0] ss:$8 sps:$4 sm:$0xff]  }
 0x255   :  { %5898 = vmatpush3.bf16.msra.mxu0 %v6669_v62  ;;  %v4408_v62 = vmax.f32 %v3897_v49, 0.0  ;;  %v6739_v49 = vld [vmem:[%s8923_s5 + $0xb0] ss:$8 sps:$4 sm:$0xff]  }
 0x256   :  { %5920 = vmatpush3.bf16.msra.mxu1 %v6670_v63  ;;  %5927 = vmatprep.subr.bf16.mxu0 %v6671_v19  ;;  %v6708_v63 = vld [vmem:[%s8923_s5 + $0x64] ss:$8 sps:$4 sm:$0xff]   ;;  %v6742_v19 = vld [vmem:[%s8923_s5 + $0x170] ss:$8 sps:$4 sm:$0xff]  }
 0x257   :  { %5949 = vmatprep.subr.bf16.mxu1 %v6672_v20  ;;  %v4418_v20 = vpack.c.bf16 %v4413_v4, %v4408_v62  ;;  %v6745_v4 = vld [vmem:[%s8923_s5 + $0xa0] ss:$8 sps:$4 sm:$0xff]  }
 0x258   :  { %4276 = vmatmul.mubr.bf16.vlgmr.msra.gmra.mxu0 %v7464_v28  ;;  %v6679_v28 = vld [vmem:[%s8920_s3 + $0xc18] ss:$20 sps:$4 sm:$0xff]   ;;  %v6790_v62 = vld [vmem:[%s8923_s5 + $0x1a0] ss:$8 sps:$4 sm:$0xff]  }
 0x259   :  { %4317 = vmatmul.mubr.bf16.vlgmr.msra.gmra.mxu1 %v7466_v29  ;;  %5928 = vmatpush3.bf16.msra.mxu0 %v6673_v5  ;;  %v6680_v29 = vld [vmem:[%s8920_s3 + $0xe98] ss:$20 sps:$4 sm:$0xff]  }
 0x25a   :  { %4357 = vmatprep.mubr.bf16.mxu0 %v7471_v37  ;;  %5950 = vmatpush3.bf16.msra.mxu1 %v6674_v6  ;;  %v6681_v37 = vld [vmem:[%s8920_s3 + $0xad8] ss:$20 sps:$4 sm:$0xff]   ;;  %v6706_v6 = vld [vmem:[%s8923_s5 + $0x60] ss:$8 sps:$4 sm:$0xff]  }
 0x25b   :  { %4398 = vmatprep.mubr.bf16.mxu1 %v7473_v38  ;;  %5929 = vmatprep.subr.bf16.mxu0 %v6675_v7  ;;  %v6682_v38 = vld [vmem:[%s8920_s3 + $0xd58] ss:$20 sps:$4 sm:$0xff]   ;;  %v6711_v7 = vld [vmem:[%s8923_s5 + $0x54] ss:$8 sps:$4 sm:$0xff]  }
 0x25c   :  { %5951 = vmatprep.subr.bf16.mxu1 %v6676_v8  ;;  %v6750_v5 = vld [vmem:[%s8923_s5 + $0x164] ss:$8 sps:$4 sm:$0xff]   ;;  %v6709_v8 = vld [vmem:[%s8923_s5 + $0x50] ss:$8 sps:$4 sm:$0xff]  }
 0x25d   :  { %5930 = vmatpush3.bf16.msra.mxu0 %v6677_v9  ;;  %v6714_v9 = vld [vmem:[%s8923_s5 + $0x44] ss:$8 sps:$4 sm:$0xff]  }
 0x25e   :  { %5952 = vmatpush3.bf16.msra.mxu1 %v6678_v18  ;;  %5931 = vmatprep.subr.bf16.mxu0 %v6679_v28  ;;  %v6754_v18 = vld [vmem:[%s8923_s5 + $0x150] ss:$8 sps:$4 sm:$0xff]   ;;  %v6762_v28 = vld [vmem:[%s8923_s5 + $0x144] ss:$8 sps:$4 sm:$0xff]  }
 0x25f   :  { %5953 = vmatprep.subr.bf16.mxu1 %v6680_v29  ;;  %v6712_v29 = vld [vmem:[%s8923_s5 + $0x40] ss:$8 sps:$4 sm:$0xff]  }
 0x261   :  { %5932 = vmatpush3.bf16.msra.mxu0 %v6681_v37  ;;  %v6717_v37 = vld [vmem:[%s8923_s5 + $0x34] ss:$8 sps:$4 sm:$0xff]  }
 0x262   :  { %5954 = vmatpush3.bf16.msra.mxu1 %v6682_v38  ;;  %5933 = vmatprep.subr.bf16.mxu0 %v6683_v23  ;;  %v6765_v38 = vld [vmem:[%s8923_s5 + $0x134] ss:$8 sps:$4 sm:$0xff]   ;;  %v6715_v23 = vld [vmem:[%s8923_s5 + $0x30] ss:$8 sps:$4 sm:$0xff]  }
 0x263   :  { %5955 = vmatprep.subr.bf16.mxu1 %v6684_v27  ;;  %v6720_v27 = vld [vmem:[%s8923_s5 + $0x24] ss:$8 sps:$4 sm:$0xff]  }
 0x265   :  { %5934 = vmatpush3.bf16.msra.mxu0 %v6685_v45  ;;  %v6768_v45 = vld [vmem:[%s8923_s5 + $0x124] ss:$8 sps:$4 sm:$0xff]  }
 0x266   :  { %5956 = vmatpush3.bf16.msra.mxu1 %v6686_v11  ;;  %5935 = vmatprep.subr.bf16.mxu0 %v6687_v15  ;;  %v6723_v11 = vld [vmem:[%s8923_s5 + $0x14] ss:$8 sps:$4 sm:$0xff]   ;;  %v6766_v15 = vld [vmem:[%s8923_s5 + $0x120] ss:$8 sps:$4 sm:$0xff]  }
 0x267   :  { %5957 = vmatprep.subr.bf16.mxu1 %v6688_v14  ;;  %v6771_v14 = vld [vmem:[%s8923_s5 + $0x114] ss:$8 sps:$4 sm:$0xff]  }
 0x269   :  { %5936 = vmatpush3.bf16.msra.mxu0 %v6689_v54  ;;  %v6726_v54 = vld [vmem:[%s8923_s5 + $0x4] ss:$8 sps:$4 sm:$0xff]  }
 0x26a   :  { %5958 = vmatpush3.bf16.msra.mxu1 %v6690_v42  ;;  %5937 = vmatprep.subr.bf16.mxu0 %v6691_v47  ;;  %v6724_v42 = vld [vmem:[%s8923_s5] ss:$8 sps:$4 sm:$0xff]   ;;  %v6729_v47 = vld [vmem:[%s8923_s5 + $0xf4] ss:$8 sps:$4 sm:$0xff]  }
 0x26b   :  { %5959 = vmatprep.subr.bf16.mxu1 %v6692_v17  ;;  %v6772_v17 = vld [vmem:[%s8923_s5 + $0x100] ss:$8 sps:$4 sm:$0xff]  }
 0x26d   :  { %5938 = vmatpush3.bf16.msra.mxu0 %v6693_v10  ;;  %v6732_v10 = vld [vmem:[%s8923_s5 + $0xe4] ss:$8 sps:$4 sm:$0xff]  }
 0x26e   :  { %5960 = vmatpush3.bf16.msra.mxu1 %v6694_v12  ;;  %5939 = vmatprep.subr.bf16.mxu0 %v6695_v52  ;;  %v6780_v12 = vld [vmem:[%s8923_s5 + $0x1e4] ss:$8 sps:$4 sm:$0xff]   ;;  %v6730_v52 = vld [vmem:[%s8923_s5 + $0xe0] ss:$8 sps:$4 sm:$0xff]  }
 0x26f   :  { %5961 = vmatprep.subr.bf16.mxu1 %v6696_v40  ;;  %v6735_v40 = vld [vmem:[%s8923_s5 + $0xd4] ss:$8 sps:$4 sm:$0xff]  }
 0x271   :  { %5940 = vmatpush3.bf16.msra.mxu0 %v6697_v13  ;;  %v6733_v13 = vld [vmem:[%s8923_s5 + $0xd0] ss:$8 sps:$4 sm:$0xff]  }
 0x272   :  { %5962 = vmatpush3.bf16.msra.mxu1 %v6698_v61  ;;  %5941 = vmatprep.subr.bf16.mxu0 %v6699_v58  ;;  %v6781_v61 = vld [vmem:[%s8923_s5 + $0x1d0] ss:$8 sps:$4 sm:$0xff]   ;;  %v6786_v58 = vld [vmem:[%s8923_s5 + $0x1c4] ss:$8 sps:$4 sm:$0xff]  }
 0x273   :  { %5963 = vmatprep.subr.bf16.mxu1 %v6700_v43  ;;  %v6741_v43 = vld [vmem:[%s8923_s5 + $0xb4] ss:$8 sps:$4 sm:$0xff]  }
 0x275   :  { %5942 = vmatpush3.bf16.msra.mxu0 %v6701_v36  ;;  %v6789_v36 = vld [vmem:[%s8923_s5 + $0x1b4] ss:$8 sps:$4 sm:$0xff]  }
 0x276   :  { %5964 = vmatpush3.bf16.msra.mxu1 %v6702_v50  ;;  %4914 = vmatprep.subr.bf16.mxu0 %v6705_v60  ;;  %v6747_v50 = vld [vmem:[%s8923_s5 + $0xa4] ss:$8 sps:$4 sm:$0xff]   ;;  %v6787_v60 = vld [vmem:[%s8923_s5 + $0x1b0] ss:$8 sps:$4 sm:$0xff]  }
 0x277   :  { %4957 = vmatprep.subr.bf16.mxu1 %v6744_v3  ;;  %v6792_v3 = vld [vmem:[%s8923_s5 + $0x1a4] ss:$8 sps:$4 sm:$0xff]  }
 0x278   :  { %4358 = vmatmul.mubr.bf16.vlgmr.msra.gmra.mxu0 %v7667_v0  ;;  %v6748_v0 = vld [vmem:[%s8923_s5 + $0x160] ss:$8 sps:$4 sm:$0xff]  }
 0x279   :  { %4399 = vmatmul.mubr.bf16.vlgmr.msra.gmra.mxu1 %v7669_v2  ;;  %4915 = vmatpush1.bf16.msra.mxu0 %v6703_v39  ;;  %v6756_v2 = vld [vmem:[%s8923_s5 + $0x154] ss:$8 sps:$4 sm:$0xff]  }
 0x27a   :  { %4946 = vmatprep.mubr.bf16.mxu0 %v4418_v20  ;;  %4916 = vmatprep.subr.bf16.mxu0 %v6708_v63  ;;  %v6753_v39 = vld [vmem:[%s8923_s5 + $0x94] ss:$8 sps:$4 sm:$0xff]   ;;  %v6759_v20 = vld [vmem:[%s8923_s5 + $0x84] ss:$8 sps:$4 sm:$0xff]  }
 0x27b   :  { %4958 = vmatpush1.bf16.msra.mxu1 %v6742_v19  ;;  %v6795_v63 = vld [vmem:[%s8923_s5 + $0x194] ss:$8 sps:$4 sm:$0xff]   ;;  %v6751_v19 = vld [vmem:[%s8923_s5 + $0x90] ss:$8 sps:$4 sm:$0xff]  }
 0x27c   :  { %4959 = vmatprep.subr.bf16.mxu1 %v6750_v5  ;;  %v6793_v5 = vld [vmem:[%s8923_s5 + $0x190] ss:$8 sps:$4 sm:$0xff]  }
 0x27d   :  { %4917 = vmatpush1.bf16.msra.mxu0 %v6706_v6  ;;  %v6798_v6 = vld [vmem:[%s8923_s5 + $0x184] ss:$8 sps:$4 sm:$0xff]  }
 0x27e   :  { %4918 = vmatprep.subr.bf16.mxu0 %v6711_v7  ;;  %v6757_v7 = vld [vmem:[%s8923_s5 + $0x80] ss:$8 sps:$4 sm:$0xff]  }
 0x27f   :  { %4960 = vmatpush1.bf16.msra.mxu1 %v6748_v0  ;;  %v6801_v0 = vld [vmem:[%s8923_s5 + $0x274] ss:$8 sps:$4 sm:$0xff]  }
 0x280   :  { %4961 = vmatprep.subr.bf16.mxu1 %v6756_v2  ;;  %v6796_v2 = vld [vmem:[%s8923_s5 + $0x180] ss:$8 sps:$4 sm:$0xff]  }
 0x281   :  { %4919 = vmatpush1.bf16.msra.mxu0 %v6709_v8  ;;  %v6799_v8 = vld [vmem:[%s8923_s5 + $0x270] ss:$8 sps:$4 sm:$0xff]  }
 0x282   :  { %4920 = vmatprep.subr.bf16.mxu0 %v6714_v9  ;;  %v6804_v9 = vld [vmem:[%s8923_s5 + $0x264] ss:$8 sps:$4 sm:$0xff]  }
 0x283   :  { %4962 = vmatpush1.bf16.msra.mxu1 %v6754_v18  ;;  %v6802_v18 = vld [vmem:[%s8923_s5 + $0x260] ss:$8 sps:$4 sm:$0xff]  }
 0x284   :  { %4963 = vmatprep.subr.bf16.mxu1 %v6762_v28  ;;  %v6807_v28 = vld [vmem:[%s8923_s5 + $0x254] ss:$8 sps:$4 sm:$0xff]  }
 0x285   :  { %4921 = vmatpush1.bf16.msra.mxu0 %v6712_v29  ;;  %v3937_v29 = vpop.f32.mrf.mxu0 }
 0x286   :  { %4922 = vmatprep.subr.bf16.mxu0 %v6717_v37  ;;  %v3980_v37 = vpop.f32.mrf.mxu1 }
 0x287   :  { %4964 = vmatpush1.bf16.msra.mxu1 %v6760_v22  ;;  %v6805_v22 = vld [vmem:[%s8923_s5 + $0x250] ss:$8 sps:$4 sm:$0xff]  }
 0x288   :  { %4965 = vmatprep.subr.bf16.mxu1 %v6765_v38  ;;  %v3939_v38 = vpop.f32.mrf.mxu0 }
 0x289   :  { %4923 = vmatpush1.bf16.msra.mxu0 %v6715_v23  ;;  %v3982_v23 = vpop.f32.mrf.mxu1 }
 0x28a   :  { %4924 = vmatprep.subr.bf16.mxu0 %v6720_v27  ;;  %v6813_v27 = vld [vmem:[%s8923_s5 + $0x234] ss:$8 sps:$4 sm:$0xff]  }
 0x28b   :  { %4966 = vmatpush1.bf16.msra.mxu1 %v6763_v44  ;;  %v3941_v44 = vpop.f32.mrf.mxu0 }
 0x28c   :  { %4967 = vmatprep.subr.bf16.mxu1 %v6768_v45  ;;  %v3984_v45 = vpop.f32.mrf.mxu1 }
 0x28d   :  { %4925 = vmatpush1.bf16.msra.mxu0 %v6718_v57  ;;  %v6811_v57 = vld [vmem:[%s8923_s5 + $0x230] ss:$8 sps:$4 sm:$0xff]  }
 0x28e   :  { %4926 = vmatprep.subr.bf16.mxu0 %v6723_v11  ;;  %v6816_v11 = vld [vmem:[%s8923_s5 + $0x224] ss:$8 sps:$4 sm:$0xff]  }
 0x28f   :  { %4968 = vmatpush1.bf16.msra.mxu1 %v6766_v15  ;;  %v3943_v15 = vpop.f32.mrf.mxu0 }
 0x290   :  { %4969 = vmatprep.subr.bf16.mxu1 %v6771_v14  ;;  %v3986_v14 = vpop.f32.mrf.mxu1 }
 0x291   :  { %4927 = vmatpush1.bf16.msra.mxu0 %v6721_v16  ;;  %v6814_v16 = vld [vmem:[%s8923_s5 + $0x220] ss:$8 sps:$4 sm:$0xff]  }
 0x292   :  { %4928 = vmatprep.subr.bf16.mxu0 %v6726_v54 }
 0x293   :  { %4970 = vmatpush1.bf16.msra.mxu1 %v6769_v41  ;;  %v6819_v41 = vld [vmem:[%s8923_s5 + $0x214] ss:$8 sps:$4 sm:$0xff]  }
 0x294   :  { %4971 = vmatprep.subr.bf16.mxu1 %v6774_v46  ;;  %v1139_v46 = vrot.slane %v8528_v21, %v7193_v35 }
 0x295   :  { %4929 = vmatpush1.bf16.msra.mxu0 %v6724_v42 }
 0x296   :  { %4930 = vmatprep.subr.bf16.mxu0 %v6729_v47  ;;  %v1135_v47 = vrot.slane %v8528_v21, %v7182_v32  ;;  %v6820_v32 = vld [vmem:[%s8923_s5 + $0x200] ss:$8 sps:$4 sm:$0xff]  }
 0x297   :  { %4972 = vmatpush1.bf16.msra.mxu1 %v6772_v17  ;;  %v6817_v17 = vld [vmem:[%s8923_s5 + $0x210] ss:$8 sps:$4 sm:$0xff]  }
 0x298   :  { %4973 = vmatprep.subr.bf16.mxu1 %v6777_v33  ;;  %v4023_v54 = vpop.f32.mrf.mxu0 }
 0x299   :  { %4931 = vmatpush2.bf16.msra.mxu0 %v6727_v55  ;;  %v4066_v42 = vpop.f32.mrf.mxu1  ;;  %v6822_v55 = vld [vmem:[%s8923_s5 + $0x204] ss:$8 sps:$4 sm:$0xff]  }
 0x29a   :  { %4932 = vmatprep.subr.bf16.mxu0 %v6732_v10  ;;  %v4025_v33 = vpop.f32.mrf.mxu0  ;;  %v3940_v10 = vadd.f32 %v3939_v38, %v1139_v46 }
 0x29b   :  { %4974 = vmatpush2.bf16.msra.mxu1 %v6775_v51  ;;  %v4068_v51 = vpop.f32.mrf.mxu1 }
 0x29c   :  { %4975 = vmatprep.subr.bf16.mxu1 %v6780_v12  ;;  %v3938_v12 = vadd.f32 %v3937_v29, %v1135_v47  ;;  %v4027_v35 = vpop.f32.mrf.mxu0 }
 0x29d   :  { %4933 = vmatpush2.bf16.msra.mxu0 %v6730_v52  ;;  %v3942_v52 = vadd.f32 %v3941_v44, %v1135_v47  ;;  %v1143_v47 = vrot.slane %v8528_v21, %v81_v26 }
 0x29e   :  { %4934 = vmatprep.subr.bf16.mxu0 %v6735_v40  ;;  %v3983_v40 = vadd.f32 %v3982_v23, %v3940_v10  ;;  %v6823_v10 = vld [vmem:[%s8924_s7 + $0x78] sm:$0xff]  }
 0x29f   :  { %4976 = vmatpush2.bf16.msra.mxu1 %v6778_v53  ;;  %v3944_v53 = vadd.f32 %v3943_v15, %v1139_v46 }
 0x2a0   :  { %4977 = vmatprep.subr.bf16.mxu1 %v6783_v56  ;;  %v4070_v56 = vpop.f32.mrf.mxu1 }
 0x2a1   :  { %4935 = vmatpush2.bf16.msra.mxu0 %v6733_v13  ;;  %v3981_v13 = vadd.f32 %v3980_v37, %v3938_v12 }
 0x2a2   :  { %4936 = vmatprep.subr.bf16.mxu0 %v6738_v48  ;;  %v3985_v48 = vadd.f32 %v3984_v45, %v3942_v52  ;;  %v6824_v52 = vld [vmem:[%s8924_s7 + $0x38] sm:$0xff]  }
 0x2a3   :  { %4978 = vmatpush2.bf16.msra.mxu1 %v6781_v61  ;;  %v4026_v61 = vadd.f32 %v4025_v33, %v3983_v40 }
 0x2a4   :  { %4979 = vmatprep.subr.bf16.mxu1 %v6786_v58  ;;  %v4024_v58 = vadd.f32 %v4023_v54, %v3981_v13 }
 0x2a5   :  { %4937 = vmatpush2.bf16.msra.mxu0 %v6736_v24  ;;  %v4029_v24 = vpop.f32.mrf.mxu0 }
 0x2a6   :  { %4938 = vmatprep.subr.bf16.mxu0 %v6741_v43  ;;  %v3987_v43 = vadd.f32 %v3986_v14, %v3944_v53  ;;  %v6827_v53 = vld [vmem:[%s8924_s7 + $0x68] sm:$0xff]  }
 0x2a7   :  { %4980 = vmatpush2.bf16.msra.mxu1 %v6784_v59  ;;  %v4028_v59 = vadd.f32 %v4027_v35, %v3985_v48  ;;  %v6826_v35 = vld [vmem:[%s8924_s7 + $0x30] sm:$0xff]  }
 0x2a8   :  { %4981 = vmatprep.subr.bf16.mxu1 %v6789_v36  ;;  %v4072_v36 = vpop.f32.mrf.mxu1 }
 0x2a9   :  { %4939 = vmatpush2.bf16.msra.mxu0 %v6739_v49 }
 0x2aa   :  { %4940 = vmatprep.subr.bf16.mxu0 %v6747_v50  ;;  %v4069_v50 = vadd.f32 %v4068_v51, %v4026_v61 }
 0x2ab   :  { %4982 = vmatpush2.bf16.msra.mxu1 %v6787_v60  ;;  %v4030_v60 = vadd.f32 %v4029_v24, %v3987_v43  ;;  %v6828_v43 = vld [vmem:[%s8924_s7 + $0x28] sm:$0xff]  }
 0x2ac   :  { %4983 = vmatprep.subr.bf16.mxu1 %v6792_v3 }
 0x2ad   :  { %4941 = vmatpush2.bf16.msra.mxu0 %v6745_v4  ;;  %v4067_v4 = vadd.f32 %v4066_v42, %v4024_v58 }
 0x2ae   :  { %4942 = vmatprep.subr.bf16.mxu0 %v6753_v39 }
 0x2af   :  { %4984 = vmatpush2.bf16.msra.mxu1 %v6790_v62  ;;  %v4071_v62 = vadd.f32 %v4070_v56, %v4028_v59 }
 0x2b0   :  { %4985 = vmatprep.subr.bf16.mxu1 %v6795_v63 }
 0x2b1   :  { %4943 = vmatpush2.bf16.msra.mxu0 %v6751_v19 }
 0x2b2   :  { %4944 = vmatprep.subr.bf16.mxu0 %v6759_v20 }
 0x2b3   :  { %4986 = vmatpush2.bf16.msra.mxu1 %v6793_v5 }
 0x2b4   :  { %4987 = vmatprep.subr.bf16.mxu1 %v6798_v6  ;;  %v4073_v6 = vadd.f32 %v4072_v36, %v4030_v60  ;;  %v6829_v36 = vld [vmem:[%s8924_s7 + $0x60] sm:$0xff]  }
 0x2b5   :  { %4945 = vmatpush2.bf16.msra.mxu0 %v6757_v7 }
 0x2b6   :  { %5000 = vmatprep.subr.bf16.mxu0 %v6801_v0 }
 0x2b7   :  { %4988 = vmatpush2.bf16.msra.mxu1 %v6796_v2 }
 0x2b8   :  { %4947 = vmatmul.mubr.bf16.vlgmr.msra.gmra.mxu0 %v8341_v25  ;;  %v6810_v25 = vld [vmem:[%s8923_s5 + $0x244] ss:$8 sps:$4 sm:$0xff]   ;;  %5971 = vmatprep.subr.bf16.mxu1 %v6823_v10 }
 0x2b9   :  { %5001 = vmatpush1.bf16.msra.mxu0 %v6799_v8  ;;  %5032 = vmatprep.mubr.bf16.mxu0 %v6840_v1  ;;  %v6808_v1 = vld [vmem:[%s8923_s5 + $0x240] ss:$8 sps:$4 sm:$0xff]  }
 0x2ba   :  { %5002 = vmatprep.subr.bf16.mxu0 %v6804_v9 }
 0x2bd   :  { %5003 = vmatpush1.bf16.msra.mxu0 %v6802_v18 }
 0x2be   :  { %5004 = vmatprep.subr.bf16.mxu0 %v6807_v28 }
 0x2c1   :  { %5005 = vmatpush1.bf16.msra.mxu0 %v6805_v22 }
 0x2c2   :  { %5006 = vmatprep.subr.bf16.mxu0 %v6810_v25 }
 0x2c5   :  { %5007 = vmatpush1.bf16.msra.mxu0 %v6808_v1 }
 0x2c6   :  { %5008 = vmatprep.subr.bf16.mxu0 %v6813_v27 }
 0x2c9   :  { %5009 = vmatpush1.bf16.msra.mxu0 %v6811_v57 }
 0x2ca   :  { %5010 = vmatprep.subr.bf16.mxu0 %v6816_v11 }
 0x2cd   :  { %5011 = vmatpush1.bf16.msra.mxu0 %v6814_v16 }
 0x2ce   :  { %5012 = vmatprep.subr.bf16.mxu0 %v6819_v41 }
 0x2d1   :  { %5013 = vmatpush1.bf16.msra.mxu0 %v6817_v17 }
 0x2d2   :  { %5014 = vmatprep.subr.bf16.mxu0 %v6822_v55 }
 0x2d5   :  { %5015 = vmatpush1.bf16.msra.mxu0 %v6820_v32 }
 0x2d8   :  { %v4109_v49 = vpop.f32.mrf.mxu0 }
 0x2d9   :  { %v4152_v3 = vpop.f32.mrf.mxu1  ;;  %v4110_v20 = vadd.f32 %v4109_v49, %v4067_v4 }
 0x2da   :  { %v4111_v39 = vpop.f32.mrf.mxu0 }
 0x2db   :  { %v4112_v63 = vadd.f32 %v4111_v39, %v4069_v50  ;;  %v4154_v19 = vpop.f32.mrf.mxu1  ;;  %v4153_v28 = vadd.f32 %v4152_v3, %v4110_v20  ;;  %v6830_v3 = vld [vmem:[%s8924_s7 + $0x20] sm:$0xff]   ;;  %v6831_v39 = vld [vmem:[%s8924_s7 + $0x58] sm:$0xff]  }
 0x2dc   :  { %v4113_v5 = vpop.f32.mrf.mxu0 }
 0x2dd   :  { %v4114_v7 = vadd.f32 %v4113_v5, %v4071_v62  ;;  %v4156_v0 = vpop.f32.mrf.mxu1  ;;  %v4155_v8 = vadd.f32 %v4154_v19, %v4112_v63  ;;  %v4409_v23 = vmax.f32 %v4153_v28, 0.0 }
 0x2de   :  { %v4115_v2 = vpop.f32.mrf.mxu0 }
 0x2df   :  { %v4157_v9 = vadd.f32 %v4156_v0, %v4114_v7  ;;  %v4116_v18 = vadd.f32 %v4115_v2, %v4073_v6  ;;  %v4158_v29 = vpop.f32.mrf.mxu1  ;;  %v4410_v25 = vmax.f32 %v4155_v8, 0.0 }
 0x2e1   :  { %v4159_v37 = vadd.f32 %v4158_v29, %v4116_v18  ;;  %v4414_v22 = vmax.f32 %v4157_v9, 0.0  ;;  %v6832_v29 = vld [vmem:[%s8924_s7 + $0x18] sm:$0xff]  }
 0x2e3   :  { %v4415_v38 = vmax.f32 %v4159_v37, 0.0  ;;  %v4419_v27 = vpack.c.bf16 %v4414_v22, %v4409_v23 }
 0x2e5   :  { %v4420_v1 = vpack.c.bf16 %v4415_v38, %v4410_v25 }
 0x2e7   :  { %4989 = vmatprep.mubr.bf16.mxu1 %v4420_v1 }
 0x2e8   :  { %4990 = vmatmul.mubr.bf16.vlgmr.msra.gmra.mxu1 %v4419_v27 }
 0x2e9   :  { %5972 = vmatpush3.bf16.msra.mxu1 %v6824_v52 }
 0x2ea   :  { %5973 = vmatprep.subr.bf16.mxu1 %v6825_v30 }
 0x2ed   :  { %5974 = vmatpush3.bf16.msra.mxu1 %v6826_v35 }
 0x2ee   :  { %5975 = vmatprep.subr.bf16.mxu1 %v6827_v53 }
 0x2f1   :  { %5976 = vmatpush3.bf16.msra.mxu1 %v6828_v43 }
 0x2f2   :  { %5977 = vmatprep.subr.bf16.mxu1 %v6829_v36 }
 0x2f5   :  { %5978 = vmatpush3.bf16.msra.mxu1 %v6830_v3  ;;  %v5822_v3 = vld [vmem:[%s8926_s8] ss:$0 sm:$0xff] }
 0x2f6   :  { %5979 = vmatprep.subr.bf16.mxu1 %v6831_v39 }
 0x2f8   :  { %v5855_v44 = vpop.f32.mrf.mxu0 }
 0x2f9   :  { %v5877_v45 = vpop.f32.mrf.mxu1  ;;  %5980 = vmatpush3.bf16.msra.mxu1 %v6832_v29 }
 0x2fa   :  { %v5856_v57 = vpop.f32.mrf.mxu0 }
 0x2fb   :  { %v5878_v11 = vpop.f32.mrf.mxu1  ;;  %v5857_v17 = vadd.f32 %v5856_v57, %v5855_v44  ;;  %v6833_v44 = vld [vmem:[%s8924_s7 + $0x50] sm:$0xff]   ;;  %v6835_v57 = vld [vmem:[%s8924_s7 + $0x48] sm:$0xff]  }
 0x2fc   :  { %v5858_v15 = vpop.f32.mrf.mxu0  ;;  %v5879_v32 = vadd.f32 %v5878_v11, %v5877_v45  ;;  %v6834_v45 = vld [vmem:[%s8924_s7 + $0x10] sm:$0xff]   ;;  %5981 = vmatprep.subr.bf16.mxu1 %v6833_v44  ;;  %v6836_v11 = vld [vmem:[%s8924_s7 + $0x8] sm:$0xff]  }
 0x2fd   :  { %v5880_v14 = vpop.f32.mrf.mxu1  ;;  %v4196_v51 = vadd.f32 %v5857_v17, %v1143_v47  ;;  %5982 = vmatpush3.bf16.msra.mxu1 %v6834_v45 }
 0x2fe   :  { %v5859_v16 = vpop.f32.mrf.mxu0  ;;  %5983 = vmatprep.subr.bf16.mxu1 %v6835_v57 }
 0x2ff   :  { %v5881_v41 = vpop.f32.mrf.mxu1  ;;  %v5860_v12 = vadd.f32 %v5859_v16, %v5858_v15  ;;  %v4237_v56 = vadd.f32 %v5879_v32, %v4196_v51  ;;  %v6837_v15 = vld [vmem:[%s8924_s7 + $0x40] sm:$0xff]  }
 0x300   :  { %v5882_v48 = vadd.f32 %v5881_v41, %v5880_v14  ;;  %v6838_v14 = vld [vmem:[%s8924_s7] sm:$0xff]  }
 0x301   :  { %v4199_v13 = vadd.f32 %v5860_v12, %v1143_v47  ;;  %5984 = vmatpush3.bf16.msra.mxu1 %v6836_v11  ;;  %v4502_v47 = vld [vmem:[%s8925_s6] sm:$0x3] }
 0x302   :  { %5985 = vmatprep.subr.bf16.mxu1 %v6837_v15  ;;  %v4511_v17 = vrot.slane %v4502_v47, %v7190_v34 }
 0x303   :  { %v4240_v49 = vadd.f32 %v5882_v48, %v4199_v13 }
 0x305   :  { %5986 = vmatpush3.bf16.msra.mxu1 %v6838_v14 }
 0x318   :  { %v5899_v54 = vpop.f32.mrf.mxu0 }
 0x319   :  { %v5921_v46 = vpop.f32.mrf.mxu1 }
 0x31a   :  { %v5900_v42 = vpop.f32.mrf.mxu0 }
 0x31b   :  { %v5922_v33 = vpop.f32.mrf.mxu1  ;;  %v5901_v26 = vadd.f32 %v5900_v42, %v5899_v54 }
 0x31c   :  { %v5902_v55 = vpop.f32.mrf.mxu0  ;;  %v5923_v50 = vadd.f32 %v5922_v33, %v5921_v46  ;;  %v4507_v33 = vrot.slane %v4502_v47, %v7179_v31 }
 0x31d   :  { %v5924_v21 = vpop.f32.mrf.mxu1  ;;  %v4278_v61 = vadd.f32 %v5901_v26, %v4237_v56 }
 0x31e   :  { %v5903_v40 = vpop.f32.mrf.mxu0 }
 0x31f   :  { %v5904_v58 = vadd.f32 %v5903_v40, %v5902_v55  ;;  %v5925_v24 = vpop.f32.mrf.mxu1  ;;  %v4319_v62 = vadd.f32 %v5923_v50, %v4278_v61 }
 0x320   :  { %v5926_v6 = vadd.f32 %v5925_v24, %v5924_v21 }
 0x321   :  { %v4281_v63 = vadd.f32 %v5904_v58, %v4240_v49 }
 0x323   :  { %v4322_v8 = vadd.f32 %v5926_v6, %v4281_v63 }
 0x338   :  { %v5943_v59 = vpop.f32.mrf.mxu0 }
 0x339   :  { %v5965_v60 = vpop.f32.mrf.mxu1 }
 0x33a   :  { %v5944_v4 = vpop.f32.mrf.mxu0 }
 0x33b   :  { %v5945_v19 = vadd.f32 %v5944_v4, %v5943_v59  ;;  %v5966_v20 = vpop.f32.mrf.mxu1 }
 0x33c   :  { %v5946_v5 = vpop.f32.mrf.mxu0  ;;  %v5967_v9 = vadd.f32 %v5966_v20, %v5965_v60 }
 0x33d   :  { %v4360_v7 = vadd.f32 %v5945_v19, %v4319_v62  ;;  %v5968_v0 = vpop.f32.mrf.mxu1 }
 0x33e   :  { %v5947_v2 = vpop.f32.mrf.mxu0 }
 0x33f   :  { %v5948_v18 = vadd.f32 %v5947_v2, %v5946_v5  ;;  %v5969_v28 = vpop.f32.mrf.mxu1  ;;  %v4401_v37 = vadd.f32 %v5967_v9, %v4360_v7 }
 0x340   :  { %v5970_v25 = vadd.f32 %v5969_v28, %v5968_v0 }
 0x341   :  { %v4363_v22 = vadd.f32 %v5948_v18, %v4322_v8  ;;  %v4411_v23 = vmax.f32 %v4401_v37, 0.0 }
 0x343   :  { %v4404_v38 = vadd.f32 %v5970_v25, %v4363_v22 }
 0x345   :  { %v4416_v1 = vmax.f32 %v4404_v38, 0.0 }
 0x347   :  { %v4421_v27 = vpack.c.bf16 %v4416_v1, %v4411_v23 }
 0x349   :  { %5033 = vmatmul.mubr.bf16.vlgmr.msra.gmra.mxu0 %v4421_v27 }
 0x378   :  { %v4948_v16 = vpop.f32.mrf.mxu0 }
 0x379   :  { %v4949_v30 = vadd.f32 %v4948_v16, %v4507_v33 }
 0x37a   :  { %v4950_v54 = vpop.f32.mrf.mxu0 }
 0x37b   :  { %v4951_v12 = vadd.f32 %v4950_v54, %v4511_v17 }
 0x37c   :  { %v4952_v46 = vpop.f32.mrf.mxu0 }
 0x37d   :  { %v4953_v52 = vadd.f32 %v4952_v46, %v4507_v33 }
 0x37e   :  { %v4954_v55 = vpop.f32.mrf.mxu0 }
 0x37f   :  { %v4955_v21 = vadd.f32 %v4954_v55, %v4511_v17 }
 0x3a8   :  { %v4991_v41 = vpop.f32.mrf.mxu1 }
 0x3a9   :  { %v4992_v53 = vadd.f32 %v4991_v41, %v4949_v30 }
 0x3aa   :  { %v4993_v42 = vpop.f32.mrf.mxu1 }
 0x3ab   :  { %v4994_v35 = vadd.f32 %v4993_v42, %v4951_v12 }
 0x3ac   :  { %v4995_v10 = vpop.f32.mrf.mxu1 }
 0x3ad   :  { %v4996_v40 = vadd.f32 %v4995_v10, %v4953_v52 }
 0x3ae   :  { %v4997_v32 = vpop.f32.mrf.mxu1 }
 0x3af   :  { %v4998_v13 = vadd.f32 %v4997_v32, %v4955_v21 }
 0x409   :  { %v5034_v51 = vpop.f32.mrf.mxu0 }
 0x40a   :  { %v5035_v58 = vadd.f32 %v5034_v51, %v4992_v53 }
 0x40b   :  { %v5036_v26 = vpop.f32.mrf.mxu0 }
 0x40c   :  { %v5037_v48 = vadd.f32 %v5036_v26, %v4994_v35  ;;  %v5043_v36 = vmax.f32 %v5035_v58, 0.0 }
 0x40d   :  { %v5038_v56 = vpop.f32.mrf.mxu0 }
 0x40e   :  { %v5039_v61 = vadd.f32 %v5038_v56, %v4996_v40  ;;  %v5044_v43 = vmax.f32 %v5037_v48, 0.0 }
 0x40f   :  { %v5040_v34 = vpop.f32.mrf.mxu0 }
 0x410   :  { %v5041_v24 = vadd.f32 %v5040_v34, %v4998_v13  ;;  %v5045_v31 = vmax.f32 %v5039_v61, 0.0 }
 0x412   :  { %v5046_v59 = vmax.f32 %v5041_v24, 0.0  ;;  %v5047_v50 = vpack.c.bf16 %v5045_v31, %v5043_v36 }
 0x414   :  { %v5048_v49 = vpack.c.bf16 %v5046_v59, %v5044_v43 }
 0x416   :  { %5216 = vmatprep.mubr.bf16.mxu1 %v5048_v49 }
 0x417   :  { %5217 = vmatmul.mubr.bf16.vlgmr.msra.gmra.mxu1 %v5047_v50 }
 0x4d7   :  { %v5987_v60 = vpop.f32.mrf.mxu1 }
 0x4d9   :  { %v5988_v4 = vpop.f32.mrf.mxu1 }
 0x4da   :  { %v5989_v39 = vadd.f32 %v5988_v4, %v5987_v60 }
 0x4db   :  { %v5990_v62 = vpop.f32.mrf.mxu1 }
 0x4dc   :  { %v5219_v63 = vadd.f32 %v5989_v39, %v5822_v3 }
 0x4dd   :  { %v5991_v19 = vpop.f32.mrf.mxu1 }
 0x4de   :  { %5225 = vst [vmem:[%s8927_s9] sm:$0xff] %v5219_v63  ;;  %v5992_v20 = vadd.f32 %v5991_v19, %v5990_v62 }
 0x4e0   :  { %v5222_v5 = vadd.f32 %v5992_v20, %v5822_v3 }
 0x4e2   :  { %5226 = vst [vmem:[%s8927_s9 + $0x8] sm:$0xff] %v5222_v5 }

</bundles_post_ra>
